<compile_context>
chip_gen: v7x
topology: tpu7x:2x2x1
jax: 0.10.0
libtpu: 0.0.40
codegen_flags: <defaults>
</compile_context>

<pallas_src>
import functools
import math

import jax
import jax.numpy as jnp
from jax import lax
from jax.experimental import pallas as pl
from jax.experimental.pallas import tpu as pltpu


# ----------------------------------------------------------------------------
# Helpers
# ----------------------------------------------------------------------------
def _round_up(x, m):
    return (x + m - 1) // m * m


def _cdiv(a, b):
    return -(-a // b)


def _unroll_for(tt):
    # Fully unroll small chunks; otherwise unroll by 8 so the LLO scheduler can
    # overlap MXU push/pop, EUP tanh and stores across iterations.
    return True if tt <= 32 else 8


def _device_vmem_bytes():
    """Trace-time VMEM capacity query with a conservative fallback (v7x)."""
    try:
        return int(pltpu.get_tpu_info().vmem_capacity_bytes)
    except Exception:
        return 64 * 1024 * 1024


def _vmem_limit_bytes():
    # v5e/v6e (128 MiB) -> 96 MiB scoped; v7x (64 MiB) -> 48 MiB.
    return int(min(_device_vmem_bytes() * 3 // 4, 96 * 1024 * 1024))


def _pick_time_chunk(T, bb, din_max, hp):
    """Pick a balanced time-chunk length from the device VMEM budget."""
    budget = int(_device_vmem_bytes() * 0.45)
    # Grid-invariant weight blocks are double-buffered by the pipeline (bf16),
    # plus the h scratch and some slack.
    fixed = 4 * (din_max * hp + hp * hp + hp * 128) + 4 * bb * hp + (1 << 16)
    # Per timestep: x block (bf16, 2 bufs) + out block (bf16, 2 bufs)
    #             + pre scratch (f32, single).
    per_t = bb * (4 * din_max + 4 * hp + 4 * hp)
    tt_max = max(8, (budget - fixed) // max(per_t, 1))
    tt_max = int(min(tt_max, 512))
    nt = max(1, _cdiv(T, tt_max))
    tt = max(1, _cdiv(T, nt))          # balanced chunks: < nt padded steps total
    return tt, nt


# ----------------------------------------------------------------------------
# In-kernel recurrence (shared by mid and top layers)
# ----------------------------------------------------------------------------
def _run_recurrence(c, pre_ref, whh, out_ref, h_ref, *, tt, t_real, unroll):
    """tanh recurrence over the real timesteps of chunk `c`.

    pre_ref: (tt, bb, hp) f32  precomputed x @ W_ih^T + (b_ih + b_hh)
    whh:     (hp, hp) bf16 value (already loaded)
    out_ref: (tt, bb, hp) bf16 ref, or None (top layer)
    h_ref:   (bb, hp) f32 scratch — state carried across grid steps; written
             exactly once per chunk.
    """
    h0 = h_ref[...]

    def step(t, h_prev):
        rec = jnp.dot(h_prev.astype(jnp.bfloat16), whh,
                      preferred_element_type=jnp.float32)
        h_new = jnp.tanh(pre_ref[t] + rec)
        if out_ref is not None:
            out_ref[t] = h_new.astype(out_ref.dtype)
        return h_new

    if t_real % tt == 0:
        # Every chunk is full: static trip count, unrolled.
        h_ref[...] = lax.fori_loop(0, tt, step, h0, unroll=unroll)
    else:
        n = jnp.minimum(tt, t_real - c * tt)   # real steps in this chunk

        @pl.when(n == tt)
        def _full():
            h_ref[...] = lax.fori_loop(0, tt, step, h0, unroll=unroll)

        @pl.when(n < tt)
        def _tail():
            # Tail chunk: run only the real timesteps; padded steps skipped.
            h_ref[...] = lax.fori_loop(0, n, step, h0)


# ----------------------------------------------------------------------------
# Kernels
# ----------------------------------------------------------------------------
def rnn_mid_layer_kernel(x_ref, wih_ref, whh_ref, b_ref, out_ref,
                         h_ref, pre_ref, *, tt, t_real, unroll):
    """One (non-final) RNN layer, one (batch-block, time-chunk) per grid step.

    x_ref:   (tt, bb, Din)  bf16 input chunk
    wih_ref: (Din, Hp)      W_ih^T, bf16, zero-padded
    whh_ref: (Hp, Hp)       W_hh^T, bf16, zero-padded
    b_ref:   (1, Hp)        b_ih + b_hh, f32, zero-padded
    out_ref: (tt, bb, Hp)   bf16 layer-output chunk
    h_ref:   (bb, Hp) f32   recurrent state (scratch, carried across chunks)
    pre_ref: (tt, bb, Hp) f32  staged input projection
    """
    c = pl.program_id(1)

    @pl.when(c == 0)
    def _init():
        h_ref[...] = jnp.zeros_like(h_ref)

    tb, bb, din = x_ref.shape
    hp = whh_ref.shape[1]

    # Hoisted input projection: one chunk-sized GEMM, bias folded in once.
    x_flat = x_ref[...].reshape(tb * bb, din)
    pre_ref[...] = (jnp.dot(x_flat, wih_ref[...],
                            preferred_element_type=jnp.float32)
                    + b_ref[...]).reshape(tb, bb, hp)

    _run_recurrence(c, pre_ref, whh_ref[...], out_ref, h_ref,
                    tt=tt, t_real=t_real, unroll=unroll)


def rnn_top_layer_kernel(x_ref, wih_ref, whh_ref, b_ref, wfc_ref, bfc_ref,
                         out_ref, h_ref, pre_ref, *, tt, t_real, unroll):
    """Final RNN layer + fused FC.  Emits only (bb, O) at the last time chunk."""
    c = pl.program_id(1)
    nc = pl.num_programs(1)

    @pl.when(c == 0)
    def _init():
        h_ref[...] = jnp.zeros_like(h_ref)

    tb, bb, din = x_ref.shape
    hp = whh_ref.shape[1]

    x_flat = x_ref[...].reshape(tb * bb, din)
    pre_ref[...] = (jnp.dot(x_flat, wih_ref[...],
                            preferred_element_type=jnp.float32)
                    + b_ref[...]).reshape(tb, bb, hp)

    _run_recurrence(c, pre_ref, whh_ref[...], None, h_ref,
                    tt=tt, t_real=t_real, unroll=unroll)

    @pl.when(c == nc - 1)
    def _finalize():
        out_ref[...] = (jnp.dot(h_ref[...].astype(jnp.bfloat16), wfc_ref[...],
                                preferred_element_type=jnp.float32)
                        + bfc_ref[...]).astype(out_ref.dtype)


# ----------------------------------------------------------------------------
# pallas_call wrappers
# ----------------------------------------------------------------------------
def _compiler_params():
    return pltpu.CompilerParams(
        dimension_semantics=("parallel", "arbitrary"),
        vmem_limit_bytes=_vmem_limit_bytes())


def _run_mid_layer(x_tm, wih, whh, b, *, tt, bb, t_real):
    tp, bp, din = x_tm.shape
    hp = whh.shape[1]
    nb, nt = bp // bb, tp // tt
    kernel = functools.partial(rnn_mid_layer_kernel, tt=tt, t_real=t_real,
                               unroll=_unroll_for(tt))
    cost = pl.CostEstimate(
        flops=2 * t_real * bp * (din + hp) * hp,
        transcendentals=t_real * bp * hp,
        bytes_accessed=2 * tp * bp * (din + hp) + 2 * (din + hp) * hp + 4 * hp,
    )
    return pl.pallas_call(
        kernel,
        out_shape=jax.ShapeDtypeStruct((tp, bp, hp), jnp.bfloat16),
        grid=(nb, nt),
        in_specs=[
            pl.BlockSpec((tt, bb, din), lambda b_, c: (c, b_, 0)),
            pl.BlockSpec((din, hp), lambda b_, c: (0, 0)),
            pl.BlockSpec((hp, hp), lambda b_, c: (0, 0)),
            pl.BlockSpec((1, hp), lambda b_, c: (0, 0)),
        ],
        out_specs=pl.BlockSpec((tt, bb, hp), lambda b_, c: (c, b_, 0)),
        scratch_shapes=[pltpu.VMEM((bb, hp), jnp.float32),
                        pltpu.VMEM((tt, bb, hp), jnp.float32)],
        compiler_params=_compiler_params(),
        cost_estimate=cost,
    )(x_tm, wih, whh, b)


def _run_top_layer(x_tm, wih, whh, b, wfc, bfc, *, tt, bb, t_real):
    tp, bp, din = x_tm.shape
    hp = whh.shape[1]
    op = wfc.shape[1]
    nb, nt = bp // bb, tp // tt
    kernel = functools.partial(rnn_top_layer_kernel, tt=tt, t_real=t_real,
                               unroll=_unroll_for(tt))
    cost = pl.CostEstimate(
        flops=2 * t_real * bp * (din + hp) * hp + 2 * bp * hp * op,
        transcendentals=t_real * bp * hp,
        bytes_accessed=(2 * tp * bp * din + 2 * (din + hp) * hp
                        + 2 * hp * op + 4 * bp * op),
    )
    return pl.pallas_call(
        kernel,
        out_shape=jax.ShapeDtypeStruct((bp, op), jnp.float32),
        grid=(nb, nt),
        in_specs=[
            pl.BlockSpec((tt, bb, din), lambda b_, c: (c, b_, 0)),
            pl.BlockSpec((din, hp), lambda b_, c: (0, 0)),
            pl.BlockSpec((hp, hp), lambda b_, c: (0, 0)),
            pl.BlockSpec((1, hp), lambda b_, c: (0, 0)),
            pl.BlockSpec((hp, op), lambda b_, c: (0, 0)),
            pl.BlockSpec((1, op), lambda b_, c: (0, 0)),
        ],
        out_specs=pl.BlockSpec((bb, op), lambda b_, c: (b_, 0)),
        scratch_shapes=[pltpu.VMEM((bb, hp), jnp.float32),
                        pltpu.VMEM((tt, bb, hp), jnp.float32)],
        compiler_params=_compiler_params(),
        cost_estimate=cost,
    )(x_tm, wih, whh, b, wfc, bfc)


@functools.partial(jax.jit, static_argnames=("output_size",))
def rnn_forward(x, params, output_size):
    """Equivalent of RNN.forward(x) for batch-first x of shape (B, T, I)."""
    B, T, input_size = x.shape

    # Batch padding / blocking.  bf16 sublane tile is (16, 128); when the batch
    # is large enough, split it into two blocks so the v7x megacore "parallel"
    # axis can shard the independent recurrences across TensorCores.
    if B > 16:
        bp = _round_up(B, 32)
        bb = bp // 2
    else:
        bp = _round_up(B, 16)
        bb = bp

    layers = params["layers"]
    hp = layers[0][1].shape[1]
    din_max = max(input_size, hp)
    tt, nt = _pick_time_chunk(T, bb, din_max, hp)
    tp = nt * tt

    # (B, T, I) -> time-major (T, B, I), bf16, zero-padded to (Tp, Bp, I).
    h = jnp.transpose(x, (1, 0, 2)).astype(jnp.bfloat16)
    h = jnp.pad(h, ((0, tp - T), (0, bp - B), (0, 0)))

    for (wih, whh, b) in layers[:-1]:
        h = _run_mid_layer(h, wih, whh, b, tt=tt, bb=bb, t_real=T)

    wih, whh, b = layers[-1]
    out = _run_top_layer(h, wih, whh, b, params["fc_w_t"], params["fc_b"],
                         tt=tt, bb=bb, t_real=T)
    return out[:B, :output_size]


# ----------------------------------------------------------------------------
# Deterministic parameter init (matches nn.RNN / nn.Linear shapes & init range)
# Weights are pre-transposed, zero-padded to lane/sublane-friendly shapes, and
# stored in bf16; biases stay f32.  Zero-padded weight rows/cols keep padded
# lanes exactly 0 through the recurrence.
# ----------------------------------------------------------------------------
def init_params(key, input_size, hidden_size, num_layers, output_size):
    hp = _round_up(hidden_size, 128)
    op = _round_up(output_size, 128)
    bound = 1.0 / math.sqrt(hidden_size)

    layers = []
    for layer in range(num_layers):
        din = input_size if layer == 0 else hidden_size
        din_p = input_size if layer == 0 else hp
        key, k1, k2, k3, k4 = jax.random.split(key, 5)
        w_ih = jax.random.uniform(k1, (hidden_size, din), jnp.float32, -bound, bound)
        w_hh = jax.random.uniform(k2, (hidden_size, hidden_size), jnp.float32, -bound, bound)
        b_ih = jax.random.uniform(k3, (hidden_size,), jnp.float32, -bound, bound)
        b_hh = jax.random.uniform(k4, (hidden_size,), jnp.float32, -bound, bound)

        wih_t = jnp.zeros((din_p, hp), jnp.float32).at[:din, :hidden_size].set(w_ih.T)
        whh_t = jnp.zeros((hp, hp), jnp.float32).at[:hidden_size, :hidden_size].set(w_hh.T)
        bias = jnp.zeros((1, hp), jnp.float32).at[0, :hidden_size].set(b_ih + b_hh)
        layers.append((wih_t.astype(jnp.bfloat16),
                       whh_t.astype(jnp.bfloat16),
                       bias))

    key, k5, k6 = jax.random.split(key, 3)
    fc_w = jax.random.uniform(k5, (output_size, hidden_size), jnp.float32, -bound, bound)
    fc_b = jax.random.uniform(k6, (output_size,), jnp.float32, -bound, bound)
    fc_w_t = jnp.zeros((hp, op), jnp.float32).at[:hidden_size, :output_size].set(fc_w.T)
    fc_bp = jnp.zeros((1, op), jnp.float32).at[0, :output_size].set(fc_b)

    return {"layers": layers,
            "fc_w_t": fc_w_t.astype(jnp.bfloat16),
            "fc_b": fc_bp}


# ----------------------------------------------------------------------------
# Pure-JAX reference with the same numerics (bf16 operands, f32 accumulation)
# ----------------------------------------------------------------------------
def rnn_forward_ref(x, params, output_size):
    h = jnp.transpose(x, (1, 0, 2)).astype(jnp.float32)       # (T, B, I)
    for (wih, whh, b) in params["layers"]:
        T, B, _ = h.shape
        hp = whh.shape[0]
        pre = jnp.dot(h.astype(jnp.bfloat16), wih,
                      preferred_element_type=jnp.float32) + b  # (T, B, Hp)
        state = jnp.zeros((B, hp), jnp.float32)
        outs = []
        for t in range(T):
            rec = jnp.dot(state.astype(jnp.bfloat16), whh,
                          preferred_element_type=jnp.float32)
            state = jnp.tanh(pre[t] + rec)
            outs.append(state)
        h = jnp.stack(outs, axis=0)
    out = jnp.dot(h[-1].astype(jnp.bfloat16), params["fc_w_t"],
                  preferred_element_type=jnp.float32) + params["fc_b"]
    return out[:, :output_size]


# ----------------------------------------------------------------------------
if __name__ == "__main__":
    # Small shapes consistent with the module's forward pass.
    B, T = 2, 8
    input_size, hidden_size, num_layers, output_size = 8, 32, 2, 4

    key = jax.random.PRNGKey(0)
    key, kx, kp = jax.random.split(key, 3)
    x = jax.random.normal(kx, (B, T, input_size), jnp.float32)
    params = init_params(kp, input_size, hidden_size, num_layers, output_size)

    out = rnn_forward(x, params, output_size=output_size)
    out = jax.block_until_ready(out)

    ref = rnn_forward_ref(x, params, output_size)
    assert out.shape == (B, output_size)
    assert jnp.allclose(out, ref, atol=2e-3, rtol=2e-3), "mismatch vs reference"

    print("KERNEL_OK")
</pallas_src>

<mosaic_0001>
module attributes {stable_mosaic.version = 11 : i64} {
  func.func @rnn_top_layer_kernel(%arg0: i32, %arg1: i32, %arg2: memref<8x16x128xbf16, #tpu.memory_space<vmem>>, %arg3: memref<128x128xbf16, #tpu.memory_space<vmem>>, %arg4: memref<128x128xbf16, #tpu.memory_space<vmem>>, %arg5: memref<1x128xf32, #tpu.memory_space<vmem>>, %arg6: memref<128x128xbf16, #tpu.memory_space<vmem>>, %arg7: memref<1x128xf32, #tpu.memory_space<vmem>>, %arg8: memref<16x128xf32, #tpu.memory_space<vmem>>, %arg9: memref<16x128xf32, #tpu.memory_space<vmem>>, %arg10: memref<8x16x128xf32, #tpu.memory_space<vmem>>) attributes {dimension_semantics = [#tpu.dimension_semantics<parallel>, #tpu.dimension_semantics<arbitrary>], iteration_bounds = array<i64: 1, 1>, scalar_prefetch = 0 : i64, scratch_operands = 2 : i64, tpu.core_type = #tpu.core_type<tc>, window_params = [{transform_indices = @transform_0, window_bounds = array<i64: 8, 16, 128>}, {pipeline_mode = #tpu.pipeline_mode<synchronous>, transform_indices = @transform_1, window_bounds = array<i64: 128, 128>}, {pipeline_mode = #tpu.pipeline_mode<synchronous>, transform_indices = @transform_2, window_bounds = array<i64: 128, 128>}, {pipeline_mode = #tpu.pipeline_mode<synchronous>, transform_indices = @transform_3, window_bounds = array<i64: 1, 128>}, {pipeline_mode = #tpu.pipeline_mode<synchronous>, transform_indices = @transform_4, window_bounds = array<i64: 128, 128>}, {pipeline_mode = #tpu.pipeline_mode<synchronous>, transform_indices = @transform_5, window_bounds = array<i64: 1, 128>}, {transform_indices = @transform_6, window_bounds = array<i64: 16, 128>}]} {
    %c0_i32 = arith.constant 0 : i32
    %0 = arith.cmpi eq, %arg1, %c0_i32 : i32
    %1 = arith.extui %0 : i1 to i32
    %c0_i32_0 = arith.constant 0 : i32
    %2 = arith.cmpi ne, %1, %c0_i32_0 : i32
    scf.if %2 {
      %cst_43 = arith.constant 0.000000e+00 : f32
      %74 = vector.broadcast %cst_43 : f32 to vector<16x128xf32>
      %c0_44 = arith.constant 0 : index
      %c0_45 = arith.constant 0 : index
      %75 = vector.load %arg9[%c0_44, %c0_45] : memref<16x128xf32, #tpu.memory_space<vmem>>, vector<16x128xf32>
      tpu.vector_store %arg9[%c0_44, %c0_45], %74 {strides = array<i32>} : memref<16x128xf32, #tpu.memory_space<vmem>>, vector<16x128xf32>,
    } else {
    }
    %c0 = arith.constant 0 : index
    %c0_1 = arith.constant 0 : index
    %c0_2 = arith.constant 0 : index
    %3 = vector.load %arg2[%c0, %c0_1, %c0_2] : memref<8x16x128xbf16, #tpu.memory_space<vmem>>, vector<8x16x128xbf16>
    %4 = vector.shape_cast %3 : vector<8x16x128xbf16> to vector<128x128xbf16>
    %c0_3 = arith.constant 0 : index
    %c0_4 = arith.constant 0 : index
    %5 = vector.load %arg3[%c0_3, %c0_4] : memref<128x128xbf16, #tpu.memory_space<vmem>>, vector<128x128xbf16>
    %cst = arith.constant dense<0.000000e+00> : vector<128x128xf32>
    %6 = tpu.matmul %4, %5, %cst {dimension_numbers = #tpu.dot_dimension_numbers<[1], [0], [0], [1], [0, 0, 1, 1], [], []>} : vector<128x128xbf16>, vector<128x128xbf16>, vector<128x128xf32> -> vector<128x128xf32>
    %c0_5 = arith.constant 0 : index
    %c0_6 = arith.constant 0 : index
    %7 = vector.load %arg5[%c0_5, %c0_6] : memref<1x128xf32, #tpu.memory_space<vmem>>, vector<1x128xf32>
    %8 = vector.broadcast %7 : vector<1x128xf32> to vector<128x128xf32>
    %9 = arith.addf %6, %8 : vector<128x128xf32>
    %10 = vector.shape_cast %9 : vector<128x128xf32> to vector<8x16x128xf32>
    %c0_7 = arith.constant 0 : index
    %c0_8 = arith.constant 0 : index
    %c0_9 = arith.constant 0 : index
    %11 = vector.load %arg10[%c0_7, %c0_8, %c0_9] : memref<8x16x128xf32, #tpu.memory_space<vmem>>, vector<8x16x128xf32>
    tpu.vector_store %arg10[%c0_7, %c0_8, %c0_9], %10 {strides = array<i32>} : memref<8x16x128xf32, #tpu.memory_space<vmem>>, vector<8x16x128xf32>,
    %c0_10 = arith.constant 0 : index
    %c0_11 = arith.constant 0 : index
    %12 = vector.load %arg4[%c0_10, %c0_11] : memref<128x128xbf16, #tpu.memory_space<vmem>>, vector<128x128xbf16>
    %c0_12 = arith.constant 0 : index
    %c0_13 = arith.constant 0 : index
    %13 = vector.load %arg9[%c0_12, %c0_13] : memref<16x128xf32, #tpu.memory_space<vmem>>, vector<16x128xf32>
    %c0_i32_14 = arith.constant 0 : i32
    %14 = arith.truncf %13 : vector<16x128xf32> to vector<16x128xbf16>
    %cst_15 = arith.constant dense<0.000000e+00> : vector<16x128xf32>
    %15 = tpu.matmul %14, %12, %cst_15 {dimension_numbers = #tpu.dot_dimension_numbers<[1], [0], [0], [1], [0, 0, 1, 1], [], []>} : vector<16x128xbf16>, vector<128x128xbf16>, vector<16x128xf32> -> vector<16x128xf32>
    %16 = arith.index_cast %c0_i32_14 : i32 to index
    %c0_16 = arith.constant 0 : index
    %c0_17 = arith.constant 0 : index
    %17 = vector.load %arg10[%16, %c0_16, %c0_17] : memref<8x16x128xf32, #tpu.memory_space<vmem>>, vector<1x16x128xf32>
    %18 = vector.shape_cast %17 : vector<1x16x128xf32> to vector<16x128xf32>
    %19 = arith.addf %18, %15 : vector<16x128xf32>
    %20 = math.tanh %19 : vector<16x128xf32>
    %c1_i32 = arith.constant 1 : i32
    %21 = arith.truncf %20 : vector<16x128xf32> to vector<16x128xbf16>
    %cst_18 = arith.constant dense<0.000000e+00> : vector<16x128xf32>
    %22 = tpu.matmul %21, %12, %cst_18 {dimension_numbers = #tpu.dot_dimension_numbers<[1], [0], [0], [1], [0, 0, 1, 1], [], []>} : vector<16x128xbf16>, vector<128x128xbf16>, vector<16x128xf32> -> vector<16x128xf32>
    %23 = arith.index_cast %c1_i32 : i32 to index
    %c0_19 = arith.constant 0 : index
    %c0_20 = arith.constant 0 : index
    %24 = vector.load %arg10[%23, %c0_19, %c0_20] : memref<8x16x128xf32, #tpu.memory_space<vmem>>, vector<1x16x128xf32>
    %25 = vector.shape_cast %24 : vector<1x16x128xf32> to vector<16x128xf32>
    %26 = arith.addf %25, %22 : vector<16x128xf32>
    %27 = math.tanh %26 : vector<16x128xf32>
    %c2_i32 = arith.constant 2 : i32
    %28 = arith.truncf %27 : vector<16x128xf32> to vector<16x128xbf16>
    %cst_21 = arith.constant dense<0.000000e+00> : vector<16x128xf32>
    %29 = tpu.matmul %28, %12, %cst_21 {dimension_numbers = #tpu.dot_dimension_numbers<[1], [0], [0], [1], [0, 0, 1, 1], [], []>} : vector<16x128xbf16>, vector<128x128xbf16>, vector<16x128xf32> -> vector<16x128xf32>
    %30 = arith.index_cast %c2_i32 : i32 to index
    %c0_22 = arith.constant 0 : index
    %c0_23 = arith.constant 0 : index
    %31 = vector.load %arg10[%30, %c0_22, %c0_23] : memref<8x16x128xf32, #tpu.memory_space<vmem>>, vector<1x16x128xf32>
    %32 = vector.shape_cast %31 : vector<1x16x128xf32> to vector<16x128xf32>
    %33 = arith.addf %32, %29 : vector<16x128xf32>
    %34 = math.tanh %33 : vector<16x128xf32>
    %c3_i32 = arith.constant 3 : i32
    %35 = arith.truncf %34 : vector<16x128xf32> to vector<16x128xbf16>
    %cst_24 = arith.constant dense<0.000000e+00> : vector<16x128xf32>
    %36 = tpu.matmul %35, %12, %cst_24 {dimension_numbers = #tpu.dot_dimension_numbers<[1], [0], [0], [1], [0, 0, 1, 1], [], []>} : vector<16x128xbf16>, vector<128x128xbf16>, vector<16x128xf32> -> vector<16x128xf32>
    %37 = arith.index_cast %c3_i32 : i32 to index
    %c0_25 = arith.constant 0 : index
    %c0_26 = arith.constant 0 : index
    %38 = vector.load %arg10[%37, %c0_25, %c0_26] : memref<8x16x128xf32, #tpu.memory_space<vmem>>, vector<1x16x128xf32>
    %39 = vector.shape_cast %38 : vector<1x16x128xf32> to vector<16x128xf32>
    %40 = arith.addf %39, %36 : vector<16x128xf32>
    %41 = math.tanh %40 : vector<16x128xf32>
    %c4_i32 = arith.constant 4 : i32
    %42 = arith.truncf %41 : vector<16x128xf32> to vector<16x128xbf16>
    %cst_27 = arith.constant dense<0.000000e+00> : vector<16x128xf32>
    %43 = tpu.matmul %42, %12, %cst_27 {dimension_numbers = #tpu.dot_dimension_numbers<[1], [0], [0], [1], [0, 0, 1, 1], [], []>} : vector<16x128xbf16>, vector<128x128xbf16>, vector<16x128xf32> -> vector<16x128xf32>
    %44 = arith.index_cast %c4_i32 : i32 to index
    %c0_28 = arith.constant 0 : index
    %c0_29 = arith.constant 0 : index
    %45 = vector.load %arg10[%44, %c0_28, %c0_29] : memref<8x16x128xf32, #tpu.memory_space<vmem>>, vector<1x16x128xf32>
    %46 = vector.shape_cast %45 : vector<1x16x128xf32> to vector<16x128xf32>
    %47 = arith.addf %46, %43 : vector<16x128xf32>
    %48 = math.tanh %47 : vector<16x128xf32>
    %c5_i32 = arith.constant 5 : i32
    %49 = arith.truncf %48 : vector<16x128xf32> to vector<16x128xbf16>
    %cst_30 = arith.constant dense<0.000000e+00> : vector<16x128xf32>
    %50 = tpu.matmul %49, %12, %cst_30 {dimension_numbers = #tpu.dot_dimension_numbers<[1], [0], [0], [1], [0, 0, 1, 1], [], []>} : vector<16x128xbf16>, vector<128x128xbf16>, vector<16x128xf32> -> vector<16x128xf32>
    %51 = arith.index_cast %c5_i32 : i32 to index
    %c0_31 = arith.constant 0 : index
    %c0_32 = arith.constant 0 : index
    %52 = vector.load %arg10[%51, %c0_31, %c0_32] : memref<8x16x128xf32, #tpu.memory_space<vmem>>, vector<1x16x128xf32>
    %53 = vector.shape_cast %52 : vector<1x16x128xf32> to vector<16x128xf32>
    %54 = arith.addf %53, %50 : vector<16x128xf32>
    %55 = math.tanh %54 : vector<16x128xf32>
    %c6_i32 = arith.constant 6 : i32
    %56 = arith.truncf %55 : vector<16x128xf32> to vector<16x128xbf16>
    %cst_33 = arith.constant dense<0.000000e+00> : vector<16x128xf32>
    %57 = tpu.matmul %56, %12, %cst_33 {dimension_numbers = #tpu.dot_dimension_numbers<[1], [0], [0], [1], [0, 0, 1, 1], [], []>} : vector<16x128xbf16>, vector<128x128xbf16>, vector<16x128xf32> -> vector<16x128xf32>
    %58 = arith.index_cast %c6_i32 : i32 to index
    %c0_34 = arith.constant 0 : index
    %c0_35 = arith.constant 0 : index
    %59 = vector.load %arg10[%58, %c0_34, %c0_35] : memref<8x16x128xf32, #tpu.memory_space<vmem>>, vector<1x16x128xf32>
    %60 = vector.shape_cast %59 : vector<1x16x128xf32> to vector<16x128xf32>
    %61 = arith.addf %60, %57 : vector<16x128xf32>
    %62 = math.tanh %61 : vector<16x128xf32>
    %c7_i32 = arith.constant 7 : i32
    %63 = arith.truncf %62 : vector<16x128xf32> to vector<16x128xbf16>
    %cst_36 = arith.constant dense<0.000000e+00> : vector<16x128xf32>
    %64 = tpu.matmul %63, %12, %cst_36 {dimension_numbers = #tpu.dot_dimension_numbers<[1], [0], [0], [1], [0, 0, 1, 1], [], []>} : vector<16x128xbf16>, vector<128x128xbf16>, vector<16x128xf32> -> vector<16x128xf32>
    %65 = arith.index_cast %c7_i32 : i32 to index
    %c0_37 = arith.constant 0 : index
    %c0_38 = arith.constant 0 : index
    %66 = vector.load %arg10[%65, %c0_37, %c0_38] : memref<8x16x128xf32, #tpu.memory_space<vmem>>, vector<1x16x128xf32>
    %67 = vector.shape_cast %66 : vector<1x16x128xf32> to vector<16x128xf32>
    %68 = arith.addf %67, %64 : vector<16x128xf32>
    %69 = math.tanh %68 : vector<16x128xf32>
    %c8_i32 = arith.constant 8 : i32
    %c0_39 = arith.constant 0 : index
    %c0_40 = arith.constant 0 : index
    %70 = vector.load %arg9[%c0_39, %c0_40] : memref<16x128xf32, #tpu.memory_space<vmem>>, vector<16x128xf32>
    tpu.vector_store %arg9[%c0_39, %c0_40], %69 {strides = array<i32>} : memref<16x128xf32, #tpu.memory_space<vmem>>, vector<16x128xf32>,
    %c0_i32_41 = arith.constant 0 : i32
    %71 = arith.cmpi eq, %arg1, %c0_i32_41 : i32
    %72 = arith.extui %71 : i1 to i32
    %c0_i32_42 = arith.constant 0 : i32
    %73 = arith.cmpi ne, %72, %c0_i32_42 : i32
    scf.if %73 {
      %c0_43 = arith.constant 0 : index
      %c0_44 = arith.constant 0 : index
      %74 = vector.load %arg9[%c0_43, %c0_44] : memref<16x128xf32, #tpu.memory_space<vmem>>, vector<16x128xf32>
      %75 = arith.truncf %74 : vector<16x128xf32> to vector<16x128xbf16>
      %c0_45 = arith.constant 0 : index
      %c0_46 = arith.constant 0 : index
      %76 = vector.load %arg6[%c0_45, %c0_46] : memref<128x128xbf16, #tpu.memory_space<vmem>>, vector<128x128xbf16>
      %cst_47 = arith.constant dense<0.000000e+00> : vector<16x128xf32>
      %77 = tpu.matmul %75, %76, %cst_47 {dimension_numbers = #tpu.dot_dimension_numbers<[1], [0], [0], [1], [0, 0, 1, 1], [], []>} : vector<16x128xbf16>, vector<128x128xbf16>, vector<16x128xf32> -> vector<16x128xf32>
      %c0_48 = arith.constant 0 : index
      %c0_49 = arith.constant 0 : index
      %78 = vector.load %arg7[%c0_48, %c0_49] : memref<1x128xf32, #tpu.memory_space<vmem>>, vector<1x128xf32>
      %79 = vector.broadcast %78 : vector<1x128xf32> to vector<16x128xf32>
      %80 = arith.addf %77, %79 : vector<16x128xf32>
      %c0_50 = arith.constant 0 : index
      %c0_51 = arith.constant 0 : index
      %81 = vector.load %arg8[%c0_50, %c0_51] : memref<16x128xf32, #tpu.memory_space<vmem>>, vector<16x128xf32>
      tpu.vector_store %arg8[%c0_50, %c0_51], %80 {strides = array<i32>} : memref<16x128xf32, #tpu.memory_space<vmem>>, vector<16x128xf32>,
    } else {
    }
    return
  }
  func.func @transform_0(%arg0: i32, %arg1: i32) -> (i32, i32, i32) {
    %c0_i32 = arith.constant 0 : i32
    %c0_i32_0 = arith.constant 0 : i32
    return %arg1, %arg0, %c0_i32 : i32, i32, i32
  }
  func.func @transform_1(%arg0: i32, %arg1: i32) -> (i32, i32) {
    %c0_i32 = arith.constant 0 : i32
    %c0_i32_0 = arith.constant 0 : i32
    %c0_i32_1 = arith.constant 0 : i32
    return %c0_i32, %c0_i32_0 : i32, i32
  }
  func.func @transform_2(%arg0: i32, %arg1: i32) -> (i32, i32) {
    %c0_i32 = arith.constant 0 : i32
    %c0_i32_0 = arith.constant 0 : i32
    %c0_i32_1 = arith.constant 0 : i32
    return %c0_i32, %c0_i32_0 : i32, i32
  }
  func.func @transform_3(%arg0: i32, %arg1: i32) -> (i32, i32) {
    %c0_i32 = arith.constant 0 : i32
    %c0_i32_0 = arith.constant 0 : i32
    %c0_i32_1 = arith.constant 0 : i32
    return %c0_i32, %c0_i32_0 : i32, i32
  }
  func.func @transform_4(%arg0: i32, %arg1: i32) -> (i32, i32) {
    %c0_i32 = arith.constant 0 : i32
    %c0_i32_0 = arith.constant 0 : i32
    %c0_i32_1 = arith.constant 0 : i32
    return %c0_i32, %c0_i32_0 : i32, i32
  }
  func.func @transform_5(%arg0: i32, %arg1: i32) -> (i32, i32) {
    %c0_i32 = arith.constant 0 : i32
    %c0_i32_0 = arith.constant 0 : i32
    %c0_i32_1 = arith.constant 0 : i32
    return %c0_i32, %c0_i32_0 : i32, i32
  }
  func.func @transform_6(%arg0: i32, %arg1: i32) -> (i32, i32) {
    %c0_i32 = arith.constant 0 : i32
    %c0_i32_0 = arith.constant 0 : i32
    return %arg0, %c0_i32 : i32, i32
  }
}

module attributes {stable_mosaic.version = 11 : i64} {
  func.func @rnn_mid_layer_kernel(%arg0: i32, %arg1: i32, %arg2: memref<8x16x8xbf16, #tpu.memory_space<vmem>>, %arg3: memref<8x128xbf16, #tpu.memory_space<vmem>>, %arg4: memref<128x128xbf16, #tpu.memory_space<vmem>>, %arg5: memref<1x128xf32, #tpu.memory_space<vmem>>, %arg6: memref<8x16x128xbf16, #tpu.memory_space<vmem>>, %arg7: memref<16x128xf32, #tpu.memory_space<vmem>>, %arg8: memref<8x16x128xf32, #tpu.memory_space<vmem>>) attributes {dimension_semantics = [#tpu.dimension_semantics<parallel>, #tpu.dimension_semantics<arbitrary>], iteration_bounds = array<i64: 1, 1>, scalar_prefetch = 0 : i64, scratch_operands = 2 : i64, tpu.core_type = #tpu.core_type<tc>, window_params = [{transform_indices = @transform_0, window_bounds = array<i64: 8, 16, 8>}, {pipeline_mode = #tpu.pipeline_mode<synchronous>, transform_indices = @transform_1, window_bounds = array<i64: 8, 128>}, {pipeline_mode = #tpu.pipeline_mode<synchronous>, transform_indices = @transform_2, window_bounds = array<i64: 128, 128>}, {pipeline_mode = #tpu.pipeline_mode<synchronous>, transform_indices = @transform_3, window_bounds = array<i64: 1, 128>}, {transform_indices = @transform_4, window_bounds = array<i64: 8, 16, 128>}]} {
    %c0_i32 = arith.constant 0 : i32
    %0 = arith.cmpi eq, %arg1, %c0_i32 : i32
    %1 = arith.extui %0 : i1 to i32
    %c0_i32_0 = arith.constant 0 : i32
    %2 = arith.cmpi ne, %1, %c0_i32_0 : i32
    scf.if %2 {
      %cst_57 = arith.constant 0.000000e+00 : f32
      %111 = vector.broadcast %cst_57 : f32 to vector<16x128xf32>
      %c0_58 = arith.constant 0 : index
      %c0_59 = arith.constant 0 : index
      %112 = vector.load %arg7[%c0_58, %c0_59] : memref<16x128xf32, #tpu.memory_space<vmem>>, vector<16x128xf32>
      tpu.vector_store %arg7[%c0_58, %c0_59], %111 {strides = array<i32>} : memref<16x128xf32, #tpu.memory_space<vmem>>, vector<16x128xf32>,
    } else {
    }
    %c0 = arith.constant 0 : index
    %c0_1 = arith.constant 0 : index
    %c0_2 = arith.constant 0 : index
    %3 = vector.load %arg2[%c0, %c0_1, %c0_2] : memref<8x16x8xbf16, #tpu.memory_space<vmem>>, vector<8x16x8xbf16>
    %4 = vector.shape_cast %3 : vector<8x16x8xbf16> to vector<128x8xbf16>
    %c0_3 = arith.constant 0 : index
    %c0_4 = arith.constant 0 : index
    %5 = vector.load %arg3[%c0_3, %c0_4] : memref<8x128xbf16, #tpu.memory_space<vmem>>, vector<8x128xbf16>
    %cst = arith.constant dense<0.000000e+00> : vector<128x128xf32>
    %6 = tpu.matmul %4, %5, %cst {dimension_numbers = #tpu.dot_dimension_numbers<[1], [0], [0], [1], [0, 0, 1, 1], [], []>} : vector<128x8xbf16>, vector<8x128xbf16>, vector<128x128xf32> -> vector<128x128xf32>
    %c0_5 = arith.constant 0 : index
    %c0_6 = arith.constant 0 : index
    %7 = vector.load %arg5[%c0_5, %c0_6] : memref<1x128xf32, #tpu.memory_space<vmem>>, vector<1x128xf32>
    %8 = vector.broadcast %7 : vector<1x128xf32> to vector<128x128xf32>
    %9 = arith.addf %6, %8 : vector<128x128xf32>
    %10 = vector.shape_cast %9 : vector<128x128xf32> to vector<8x16x128xf32>
    %c0_7 = arith.constant 0 : index
    %c0_8 = arith.constant 0 : index
    %c0_9 = arith.constant 0 : index
    %11 = vector.load %arg8[%c0_7, %c0_8, %c0_9] : memref<8x16x128xf32, #tpu.memory_space<vmem>>, vector<8x16x128xf32>
    tpu.vector_store %arg8[%c0_7, %c0_8, %c0_9], %10 {strides = array<i32>} : memref<8x16x128xf32, #tpu.memory_space<vmem>>, vector<8x16x128xf32>,
    %c0_10 = arith.constant 0 : index
    %c0_11 = arith.constant 0 : index
    %12 = vector.load %arg4[%c0_10, %c0_11] : memref<128x128xbf16, #tpu.memory_space<vmem>>, vector<128x128xbf16>
    %c0_12 = arith.constant 0 : index
    %c0_13 = arith.constant 0 : index
    %13 = vector.load %arg7[%c0_12, %c0_13] : memref<16x128xf32, #tpu.memory_space<vmem>>, vector<16x128xf32>
    %c0_i32_14 = arith.constant 0 : i32
    %14 = arith.truncf %13 : vector<16x128xf32> to vector<16x128xbf16>
    %cst_15 = arith.constant dense<0.000000e+00> : vector<16x128xf32>
    %15 = tpu.matmul %14, %12, %cst_15 {dimension_numbers = #tpu.dot_dimension_numbers<[1], [0], [0], [1], [0, 0, 1, 1], [], []>} : vector<16x128xbf16>, vector<128x128xbf16>, vector<16x128xf32> -> vector<16x128xf32>
    %16 = arith.index_cast %c0_i32_14 : i32 to index
    %c0_16 = arith.constant 0 : index
    %c0_17 = arith.constant 0 : index
    %17 = vector.load %arg8[%16, %c0_16, %c0_17] : memref<8x16x128xf32, #tpu.memory_space<vmem>>, vector<1x16x128xf32>
    %18 = vector.shape_cast %17 : vector<1x16x128xf32> to vector<16x128xf32>
    %19 = arith.addf %18, %15 : vector<16x128xf32>
    %20 = math.tanh %19 : vector<16x128xf32>
    %21 = arith.truncf %20 : vector<16x128xf32> to vector<16x128xbf16>
    %22 = arith.index_cast %c0_i32_14 : i32 to index
    %c0_18 = arith.constant 0 : index
    %c0_19 = arith.constant 0 : index
    %23 = vector.load %arg6[%22, %c0_18, %c0_19] : memref<8x16x128xbf16, #tpu.memory_space<vmem>>, vector<1x16x128xbf16>
    %24 = vector.shape_cast %23 : vector<1x16x128xbf16> to vector<16x128xbf16>
    %25 = vector.shape_cast %21 : vector<16x128xbf16> to vector<1x16x128xbf16>
    tpu.vector_store %arg6[%22, %c0_18, %c0_19], %25 {strides = array<i32>} : memref<8x16x128xbf16, #tpu.memory_space<vmem>>, vector<1x16x128xbf16>,
    %c1_i32 = arith.constant 1 : i32
    %26 = arith.truncf %20 : vector<16x128xf32> to vector<16x128xbf16>
    %cst_20 = arith.constant dense<0.000000e+00> : vector<16x128xf32>
    %27 = tpu.matmul %26, %12, %cst_20 {dimension_numbers = #tpu.dot_dimension_numbers<[1], [0], [0], [1], [0, 0, 1, 1], [], []>} : vector<16x128xbf16>, vector<128x128xbf16>, vector<16x128xf32> -> vector<16x128xf32>
    %28 = arith.index_cast %c1_i32 : i32 to index
    %c0_21 = arith.constant 0 : index
    %c0_22 = arith.constant 0 : index
    %29 = vector.load %arg8[%28, %c0_21, %c0_22] : memref<8x16x128xf32, #tpu.memory_space<vmem>>, vector<1x16x128xf32>
    %30 = vector.shape_cast %29 : vector<1x16x128xf32> to vector<16x128xf32>
    %31 = arith.addf %30, %27 : vector<16x128xf32>
    %32 = math.tanh %31 : vector<16x128xf32>
    %33 = arith.truncf %32 : vector<16x128xf32> to vector<16x128xbf16>
    %34 = arith.index_cast %c1_i32 : i32 to index
    %c0_23 = arith.constant 0 : index
    %c0_24 = arith.constant 0 : index
    %35 = vector.load %arg6[%34, %c0_23, %c0_24] : memref<8x16x128xbf16, #tpu.memory_space<vmem>>, vector<1x16x128xbf16>
    %36 = vector.shape_cast %35 : vector<1x16x128xbf16> to vector<16x128xbf16>
    %37 = vector.shape_cast %33 : vector<16x128xbf16> to vector<1x16x128xbf16>
    tpu.vector_store %arg6[%34, %c0_23, %c0_24], %37 {strides = array<i32>} : memref<8x16x128xbf16, #tpu.memory_space<vmem>>, vector<1x16x128xbf16>,
    %c2_i32 = arith.constant 2 : i32
    %38 = arith.truncf %32 : vector<16x128xf32> to vector<16x128xbf16>
    %cst_25 = arith.constant dense<0.000000e+00> : vector<16x128xf32>
    %39 = tpu.matmul %38, %12, %cst_25 {dimension_numbers = #tpu.dot_dimension_numbers<[1], [0], [0], [1], [0, 0, 1, 1], [], []>} : vector<16x128xbf16>, vector<128x128xbf16>, vector<16x128xf32> -> vector<16x128xf32>
    %40 = arith.index_cast %c2_i32 : i32 to index
    %c0_26 = arith.constant 0 : index
    %c0_27 = arith.constant 0 : index
    %41 = vector.load %arg8[%40, %c0_26, %c0_27] : memref<8x16x128xf32, #tpu.memory_space<vmem>>, vector<1x16x128xf32>
    %42 = vector.shape_cast %41 : vector<1x16x128xf32> to vector<16x128xf32>
    %43 = arith.addf %42, %39 : vector<16x128xf32>
    %44 = math.tanh %43 : vector<16x128xf32>
    %45 = arith.truncf %44 : vector<16x128xf32> to vector<16x128xbf16>
    %46 = arith.index_cast %c2_i32 : i32 to index
    %c0_28 = arith.constant 0 : index
    %c0_29 = arith.constant 0 : index
    %47 = vector.load %arg6[%46, %c0_28, %c0_29] : memref<8x16x128xbf16, #tpu.memory_space<vmem>>, vector<1x16x128xbf16>
    %48 = vector.shape_cast %47 : vector<1x16x128xbf16> to vector<16x128xbf16>
    %49 = vector.shape_cast %45 : vector<16x128xbf16> to vector<1x16x128xbf16>
    tpu.vector_store %arg6[%46, %c0_28, %c0_29], %49 {strides = array<i32>} : memref<8x16x128xbf16, #tpu.memory_space<vmem>>, vector<1x16x128xbf16>,
    %c3_i32 = arith.constant 3 : i32
    %50 = arith.truncf %44 : vector<16x128xf32> to vector<16x128xbf16>
    %cst_30 = arith.constant dense<0.000000e+00> : vector<16x128xf32>
    %51 = tpu.matmul %50, %12, %cst_30 {dimension_numbers = #tpu.dot_dimension_numbers<[1], [0], [0], [1], [0, 0, 1, 1], [], []>} : vector<16x128xbf16>, vector<128x128xbf16>, vector<16x128xf32> -> vector<16x128xf32>
    %52 = arith.index_cast %c3_i32 : i32 to index
    %c0_31 = arith.constant 0 : index
    %c0_32 = arith.constant 0 : index
    %53 = vector.load %arg8[%52, %c0_31, %c0_32] : memref<8x16x128xf32, #tpu.memory_space<vmem>>, vector<1x16x128xf32>
    %54 = vector.shape_cast %53 : vector<1x16x128xf32> to vector<16x128xf32>
    %55 = arith.addf %54, %51 : vector<16x128xf32>
    %56 = math.tanh %55 : vector<16x128xf32>
    %57 = arith.truncf %56 : vector<16x128xf32> to vector<16x128xbf16>
    %58 = arith.index_cast %c3_i32 : i32 to index
    %c0_33 = arith.constant 0 : index
    %c0_34 = arith.constant 0 : index
    %59 = vector.load %arg6[%58, %c0_33, %c0_34] : memref<8x16x128xbf16, #tpu.memory_space<vmem>>, vector<1x16x128xbf16>
    %60 = vector.shape_cast %59 : vector<1x16x128xbf16> to vector<16x128xbf16>
    %61 = vector.shape_cast %57 : vector<16x128xbf16> to vector<1x16x128xbf16>
    tpu.vector_store %arg6[%58, %c0_33, %c0_34], %61 {strides = array<i32>} : memref<8x16x128xbf16, #tpu.memory_space<vmem>>, vector<1x16x128xbf16>,
    %c4_i32 = arith.constant 4 : i32
    %62 = arith.truncf %56 : vector<16x128xf32> to vector<16x128xbf16>
    %cst_35 = arith.constant dense<0.000000e+00> : vector<16x128xf32>
    %63 = tpu.matmul %62, %12, %cst_35 {dimension_numbers = #tpu.dot_dimension_numbers<[1], [0], [0], [1], [0, 0, 1, 1], [], []>} : vector<16x128xbf16>, vector<128x128xbf16>, vector<16x128xf32> -> vector<16x128xf32>
    %64 = arith.index_cast %c4_i32 : i32 to index
    %c0_36 = arith.constant 0 : index
    %c0_37 = arith.constant 0 : index
    %65 = vector.load %arg8[%64, %c0_36, %c0_37] : memref<8x16x128xf32, #tpu.memory_space<vmem>>, vector<1x16x128xf32>
    %66 = vector.shape_cast %65 : vector<1x16x128xf32> to vector<16x128xf32>
    %67 = arith.addf %66, %63 : vector<16x128xf32>
    %68 = math.tanh %67 : vector<16x128xf32>
    %69 = arith.truncf %68 : vector<16x128xf32> to vector<16x128xbf16>
    %70 = arith.index_cast %c4_i32 : i32 to index
    %c0_38 = arith.constant 0 : index
    %c0_39 = arith.constant 0 : index
    %71 = vector.load %arg6[%70, %c0_38, %c0_39] : memref<8x16x128xbf16, #tpu.memory_space<vmem>>, vector<1x16x128xbf16>
    %72 = vector.shape_cast %71 : vector<1x16x128xbf16> to vector<16x128xbf16>
    %73 = vector.shape_cast %69 : vector<16x128xbf16> to vector<1x16x128xbf16>
    tpu.vector_store %arg6[%70, %c0_38, %c0_39], %73 {strides = array<i32>} : memref<8x16x128xbf16, #tpu.memory_space<vmem>>, vector<1x16x128xbf16>,
    %c5_i32 = arith.constant 5 : i32
    %74 = arith.truncf %68 : vector<16x128xf32> to vector<16x128xbf16>
    %cst_40 = arith.constant dense<0.000000e+00> : vector<16x128xf32>
    %75 = tpu.matmul %74, %12, %cst_40 {dimension_numbers = #tpu.dot_dimension_numbers<[1], [0], [0], [1], [0, 0, 1, 1], [], []>} : vector<16x128xbf16>, vector<128x128xbf16>, vector<16x128xf32> -> vector<16x128xf32>
    %76 = arith.index_cast %c5_i32 : i32 to index
    %c0_41 = arith.constant 0 : index
    %c0_42 = arith.constant 0 : index
    %77 = vector.load %arg8[%76, %c0_41, %c0_42] : memref<8x16x128xf32, #tpu.memory_space<vmem>>, vector<1x16x128xf32>
    %78 = vector.shape_cast %77 : vector<1x16x128xf32> to vector<16x128xf32>
    %79 = arith.addf %78, %75 : vector<16x128xf32>
    %80 = math.tanh %79 : vector<16x128xf32>
    %81 = arith.truncf %80 : vector<16x128xf32> to vector<16x128xbf16>
    %82 = arith.index_cast %c5_i32 : i32 to index
    %c0_43 = arith.constant 0 : index
    %c0_44 = arith.constant 0 : index
    %83 = vector.load %arg6[%82, %c0_43, %c0_44] : memref<8x16x128xbf16, #tpu.memory_space<vmem>>, vector<1x16x128xbf16>
    %84 = vector.shape_cast %83 : vector<1x16x128xbf16> to vector<16x128xbf16>
    %85 = vector.shape_cast %81 : vector<16x128xbf16> to vector<1x16x128xbf16>
    tpu.vector_store %arg6[%82, %c0_43, %c0_44], %85 {strides = array<i32>} : memref<8x16x128xbf16, #tpu.memory_space<vmem>>, vector<1x16x128xbf16>,
    %c6_i32 = arith.constant 6 : i32
    %86 = arith.truncf %80 : vector<16x128xf32> to vector<16x128xbf16>
    %cst_45 = arith.constant dense<0.000000e+00> : vector<16x128xf32>
    %87 = tpu.matmul %86, %12, %cst_45 {dimension_numbers = #tpu.dot_dimension_numbers<[1], [0], [0], [1], [0, 0, 1, 1], [], []>} : vector<16x128xbf16>, vector<128x128xbf16>, vector<16x128xf32> -> vector<16x128xf32>
    %88 = arith.index_cast %c6_i32 : i32 to index
    %c0_46 = arith.constant 0 : index
    %c0_47 = arith.constant 0 : index
    %89 = vector.load %arg8[%88, %c0_46, %c0_47] : memref<8x16x128xf32, #tpu.memory_space<vmem>>, vector<1x16x128xf32>
    %90 = vector.shape_cast %89 : vector<1x16x128xf32> to vector<16x128xf32>
    %91 = arith.addf %90, %87 : vector<16x128xf32>
    %92 = math.tanh %91 : vector<16x128xf32>
    %93 = arith.truncf %92 : vector<16x128xf32> to vector<16x128xbf16>
    %94 = arith.index_cast %c6_i32 : i32 to index
    %c0_48 = arith.constant 0 : index
    %c0_49 = arith.constant 0 : index
    %95 = vector.load %arg6[%94, %c0_48, %c0_49] : memref<8x16x128xbf16, #tpu.memory_space<vmem>>, vector<1x16x128xbf16>
    %96 = vector.shape_cast %95 : vector<1x16x128xbf16> to vector<16x128xbf16>
    %97 = vector.shape_cast %93 : vector<16x128xbf16> to vector<1x16x128xbf16>
    tpu.vector_store %arg6[%94, %c0_48, %c0_49], %97 {strides = array<i32>} : memref<8x16x128xbf16, #tpu.memory_space<vmem>>, vector<1x16x128xbf16>,
    %c7_i32 = arith.constant 7 : i32
    %98 = arith.truncf %92 : vector<16x128xf32> to vector<16x128xbf16>
    %cst_50 = arith.constant dense<0.000000e+00> : vector<16x128xf32>
    %99 = tpu.matmul %98, %12, %cst_50 {dimension_numbers = #tpu.dot_dimension_numbers<[1], [0], [0], [1], [0, 0, 1, 1], [], []>} : vector<16x128xbf16>, vector<128x128xbf16>, vector<16x128xf32> -> vector<16x128xf32>
    %100 = arith.index_cast %c7_i32 : i32 to index
    %c0_51 = arith.constant 0 : index
    %c0_52 = arith.constant 0 : index
    %101 = vector.load %arg8[%100, %c0_51, %c0_52] : memref<8x16x128xf32, #tpu.memory_space<vmem>>, vector<1x16x128xf32>
    %102 = vector.shape_cast %101 : vector<1x16x128xf32> to vector<16x128xf32>
    %103 = arith.addf %102, %99 : vector<16x128xf32>
    %104 = math.tanh %103 : vector<16x128xf32>
    %105 = arith.truncf %104 : vector<16x128xf32> to vector<16x128xbf16>
    %106 = arith.index_cast %c7_i32 : i32 to index
    %c0_53 = arith.constant 0 : index
    %c0_54 = arith.constant 0 : index
    %107 = vector.load %arg6[%106, %c0_53, %c0_54] : memref<8x16x128xbf16, #tpu.memory_space<vmem>>, vector<1x16x128xbf16>
    %108 = vector.shape_cast %107 : vector<1x16x128xbf16> to vector<16x128xbf16>
    %109 = vector.shape_cast %105 : vector<16x128xbf16> to vector<1x16x128xbf16>
    tpu.vector_store %arg6[%106, %c0_53, %c0_54], %109 {strides = array<i32>} : memref<8x16x128xbf16, #tpu.memory_space<vmem>>, vector<1x16x128xbf16>,
    %c8_i32 = arith.constant 8 : i32
    %c0_55 = arith.constant 0 : index
    %c0_56 = arith.constant 0 : index
    %110 = vector.load %arg7[%c0_55, %c0_56] : memref<16x128xf32, #tpu.memory_space<vmem>>, vector<16x128xf32>
    tpu.vector_store %arg7[%c0_55, %c0_56], %104 {strides = array<i32>} : memref<16x128xf32, #tpu.memory_space<vmem>>, vector<16x128xf32>,
    return
  }
  func.func @transform_0(%arg0: i32, %arg1: i32) -> (i32, i32, i32) {
    %c0_i32 = arith.constant 0 : i32
    %c0_i32_0 = arith.constant 0 : i32
    return %arg1, %arg0, %c0_i32 : i32, i32, i32
  }
  func.func @transform_1(%arg0: i32, %arg1: i32) -> (i32, i32) {
    %c0_i32 = arith.constant 0 : i32
    %c0_i32_0 = arith.constant 0 : i32
    %c0_i32_1 = arith.constant 0 : i32
    return %c0_i32, %c0_i32_0 : i32, i32
  }
  func.func @transform_2(%arg0: i32, %arg1: i32) -> (i32, i32) {
    %c0_i32 = arith.constant 0 : i32
    %c0_i32_0 = arith.constant 0 : i32
    %c0_i32_1 = arith.constant 0 : i32
    return %c0_i32, %c0_i32_0 : i32, i32
  }
  func.func @transform_3(%arg0: i32, %arg1: i32) -> (i32, i32) {
    %c0_i32 = arith.constant 0 : i32
    %c0_i32_0 = arith.constant 0 : i32
    %c0_i32_1 = arith.constant 0 : i32
    return %c0_i32, %c0_i32_0 : i32, i32
  }
  func.func @transform_4(%arg0: i32, %arg1: i32) -> (i32, i32, i32) {
    %c0_i32 = arith.constant 0 : i32
    %c0_i32_0 = arith.constant 0 : i32
    return %arg1, %arg0, %c0_i32 : i32, i32, i32
  }
}

</mosaic_0001>

<bundles_post_ra>
// kernel: rnn_forward.2
= control target key start
LH: loop header
LB: loop body
LE: loop exit
PB: predicated region body
PF: predicated region fallthrough
CT: control target
= control target key end

     0   :  { %v1202_v0 = vmov 0.0   ;;  %vm1203_vm0 = vmmov 0   ;;  %vm113_vm1 = vcmask 1043456   ;;  %vm88_vm2 = vcmask 64512   ;;  %s1530_s2 = inlined_call_operand.vmem [shape: bf16[128,128], index: 2, kind: input, shape index: {}]   ;;  %s1531_s1 = inlined_call_operand.vmem [shape: bf16[8,128], index: 1, kind: input, shape index: {}]   ;;  %s1532_s0 = inlined_call_operand.vmem [shape: bf16[8,16,8], index: 0, kind: input, shape index: {}]   ;;  %s1533_s3 = inlined_call_operand.vmem [shape: f32[1,128], index: 3, kind: input, shape index: {}]   ;;  %s1534_s4 = inlined_call_operand.vmem [shape: bf16[8,16,128], index: 4, kind: output, shape index: {}]  }
   0x1   :  { %990 = vmatprep.subr.bf16.mxu1 %v1202_v0  ;;  %v1234_v1 = vld [vmem:[%s1530_s2] sm:$0xff]   ;;  %1006 = vmatprep.mubr.msk.bf16.mxu1 %vm1203_vm0, %v1202_v0  ;;  %v1242_v2 = vld [vmem:[%s1530_s2 + $0x8] sm:$0xff]   ;;  %v1248_v3 = vld [vmem:[%s1530_s2 + $0x10] sm:$0xff]   ;;  %v1204_v15 = vmov 0.0|0.0  }
   0x2   :  { %991 = vmatpush3.bf16.msra.mxu1 %v1234_v1  ;;  %v40_v4 = vld [vmem:[%s1531_s1] sm:$0xf]  ;;  %v1162_v7 = vld [vmem:[%s1532_s0 + $0x8] sm:$0xff]   ;;  %v1267_v8 = vld [vmem:[%s1530_s2 + $0x18] sm:$0xff]  }
   0x3   :  { %992 = vmatprep.subr.bf16.mxu1 %v1202_v0  ;;  %1150 = vmatprep.subr.msk.bf16.mxu0 %vm113_vm1, %v40_v4  ;;  %v115_v5 = vsel %vm113_vm1, %v40_v4, 0  ;;  %v1160_v6 = vld [vmem:[%s1532_s0] sm:$0xff]   ;;  %v1164_v9 = vld [vmem:[%s1532_s0 + $0x10] sm:$0xff]   ;;  %v1165_v11 = vld [vmem:[%s1532_s0 + $0x18] sm:$0xff]  }
   0x4   :  { %973 = vmatpush3.bf16.msra.mxu0 %v115_v5  ;;  %974 = vmatprep.mubr.msk.bf16.mxu0 %vm88_vm2, %v1160_v6  ;;  %v1277_v10 = vld [vmem:[%s1530_s2 + $0x20] sm:$0xff]   ;;  %v1293_v12 = vld [vmem:[%s1530_s2 + $0x28] sm:$0xff]   ;;  %v1303_v13 = vld [vmem:[%s1530_s2 + $0x30] sm:$0xff]  }
   0x5   :  { %1010 = vmatprep.subr.bf16.mxu0 %v1202_v0  ;;  %v1312_v14 = vld [vmem:[%s1530_s2 + $0x38] sm:$0xff]   ;;  %v1166_v16 = vld [vmem:[%s1532_s0 + $0x20] sm:$0xff]   ;;  %v1167_v17 = vld [vmem:[%s1532_s0 + $0x28] sm:$0xff]  }
   0x6   :  { %993 = vmatpush3.bf16.msra.mxu1 %v1242_v2  ;;  %v1168_v18 = vld [vmem:[%s1532_s0 + $0x30] sm:$0xff]   ;;  %v1169_v19 = vld [vmem:[%s1532_s0 + $0x38] sm:$0xff]   ;;  %v1372_v28 = vld [vmem:[%s1533_s3] ss:$0 sm:$0xff] }
   0x7   :  { %994 = vmatprep.subr.bf16.mxu1 %v1202_v0  ;;  %975 = vmatmul.mubr.msk.bf16.vlgmr.msra.gmra.mrb[0].mxu0 %vm88_vm2, %v1162_v7 }
   0x8   :  { %1011 = vmatpush3.bf16.msra.mxu0 %v1234_v1  ;;  %978 = vmatprep.mubr.msk.bf16.mxu0 %vm88_vm2, %v1164_v9 }
   0x9   :  { %1012 = vmatprep.subr.bf16.mxu0 %v1202_v0 }
   0xa   :  { %995 = vmatpush3.bf16.msra.mxu1 %v1248_v3 }
   0xb   :  { %996 = vmatprep.subr.bf16.mxu1 %v1202_v0 }
   0xc   :  { %1013 = vmatpush3.bf16.msra.mxu0 %v1242_v2 }
   0xd   :  { %1014 = vmatprep.subr.bf16.mxu0 %v1202_v0 }
   0xe   :  { %997 = vmatpush3.bf16.msra.mxu1 %v1267_v8 }
   0xf   :  { %998 = vmatprep.subr.bf16.mxu1 %v1202_v0  ;;  %979 = vmatmul.mubr.msk.bf16.gmra.mrb[4].mxu0 %vm88_vm2, %v1165_v11 }
  0x10   :  { %1015 = vmatpush3.bf16.msra.mxu0 %v1248_v3  ;;  %982 = vmatprep.mubr.msk.bf16.mxu0 %vm88_vm2, %v1166_v16 }
  0x11   :  { %1016 = vmatprep.subr.bf16.mxu0 %v1202_v0 }
  0x12   :  { %999 = vmatpush3.bf16.msra.mxu1 %v1277_v10 }
  0x13   :  { %1000 = vmatprep.subr.bf16.mxu1 %v1202_v0 }
  0x14   :  { %1017 = vmatpush3.bf16.msra.mxu0 %v1267_v8 }
  0x15   :  { %1018 = vmatprep.subr.bf16.mxu0 %v1202_v0 }
  0x16   :  { %1001 = vmatpush3.bf16.msra.mxu1 %v1293_v12 }
  0x17   :  { %1002 = vmatprep.subr.bf16.mxu1 %v1202_v0  ;;  %983 = vmatmul.mubr.msk.bf16.gmra.mrb[8].mxu0 %vm88_vm2, %v1167_v17 }
  0x18   :  { %1019 = vmatpush3.bf16.msra.mxu0 %v1277_v10  ;;  %986 = vmatprep.mubr.msk.bf16.mxu0 %vm88_vm2, %v1168_v18 }
  0x19   :  { %1020 = vmatprep.subr.bf16.mxu0 %v1202_v0 }
  0x1a   :  { %1003 = vmatpush3.bf16.msra.mxu1 %v1303_v13 }
  0x1b   :  { %1004 = vmatprep.subr.bf16.mxu1 %v1202_v0 }
  0x1c   :  { %1021 = vmatpush3.bf16.msra.mxu0 %v1293_v12 }
  0x1d   :  { %1022 = vmatprep.subr.bf16.mxu0 %v1202_v0 }
  0x1e   :  { %1005 = vmatpush3.bf16.msra.mxu1 %v1312_v14 }
  0x1f   :  { %1030 = vmatprep.subr.bf16.mxu1 %v1202_v0  ;;  %987 = vmatmul.mubr.msk.bf16.gmra.mrb[12].mxu0 %vm88_vm2, %v1169_v19 }
  0x20   :  { %1023 = vmatpush3.bf16.msra.mxu0 %v1303_v13  ;;  %1026 = vmatprep.mubr.msk.bf16.mxu0 %vm1203_vm0, %v1202_v0 }
  0x21   :  { %1007 = vmatmul.mubr.bf16.vlgmr.msra.gmra.mrb[0].mxu1 %v1204_v15  ;;  %1024 = vmatprep.subr.bf16.mxu0 %v1202_v0 }
  0x22   :  { %1031 = vmatpush3.bf16.msra.mxu1 %v1234_v1  ;;  %1046 = vmatprep.mubr.msk.bf16.mxu1 %vm1203_vm0, %v1202_v0 }
  0x23   :  { %1032 = vmatprep.subr.bf16.mxu1 %v1202_v0 }
  0x24   :  { %1025 = vmatpush3.bf16.msra.mxu0 %v1312_v14 }
  0x25   :  { %1050 = vmatprep.subr.bf16.mxu0 %v1202_v0 }
  0x26   :  { %1033 = vmatpush3.bf16.msra.mxu1 %v1242_v2 }
  0x27   :  { %1034 = vmatprep.subr.bf16.mxu1 %v1202_v0 }
  0x2a   :  { %1035 = vmatpush3.bf16.msra.mxu1 %v1248_v3 }
  0x2b   :  { %1036 = vmatprep.subr.bf16.mxu1 %v1202_v0 }
  0x2e   :  { %1037 = vmatpush3.bf16.msra.mxu1 %v1267_v8 }
  0x2f   :  { %1038 = vmatprep.subr.bf16.mxu1 %v1202_v0 }
  0x32   :  { %1039 = vmatpush3.bf16.msra.mxu1 %v1277_v10 }
  0x33   :  { %1040 = vmatprep.subr.bf16.mxu1 %v1202_v0 }
  0x36   :  { %1041 = vmatpush3.bf16.msra.mxu1 %v1293_v12 }
  0x37   :  { %1042 = vmatprep.subr.bf16.mxu1 %v1202_v0 }
  0x3a   :  { %1043 = vmatpush3.bf16.msra.mxu1 %v1303_v13 }
  0x3b   :  { %1044 = vmatprep.subr.bf16.mxu1 %v1202_v0 }
  0x3e   :  { %1045 = vmatpush3.bf16.msra.mxu1 %v1312_v14 }
  0x3f   :  { %1070 = vmatprep.subr.bf16.mxu1 %v1202_v0 }
  0xda   :  { %v976_v20 = vpop.f32.mrb[0].mxu0 }
  0xdb   :  { %v151_v21 = vpop.f32.mrb[1].mxu0  ;;  %v160_v48 = vadd.f32 %v976_v20, %v1372_v28 }
  0xdc   :  { %v977_v22 = vpop.f32.mrb[2].mxu0  ;;  %v152_v29 = vadd.f32 %v1372_v28, %v151_v21 }
  0xdd   :  { %v154_v23 = vpop.f32.mrb[3].mxu0  ;;  %v163_v50 = vadd.f32 %v977_v22, %v1372_v28 }
  0xde   :  { %v155_v31 = vadd.f32 %v1372_v28, %v154_v23 }
  0xe2   :  { %v1361_v24 = vpop.f32.mrb[4].mxu0 }
  0xe3   :  { %v1363_v25 = vpop.f32.mrb[5].mxu0  ;;  %v176_v15 = vadd.f32 %v1361_v24, %v1372_v28 }
  0xe4   :  { %v1365_v26 = vpop.f32.mrb[6].mxu0  ;;  %v168_v59 = vadd.f32 %v1372_v28, %v1363_v25 }
  0xe5   :  { %v1367_v27 = vpop.f32.mrb[7].mxu0  ;;  %v179_v17 = vadd.f32 %v1365_v26, %v1372_v28 }
  0xe6   :  { %v171_v61 = vadd.f32 %v1372_v28, %v1367_v27 }
  0xea   :  { %v1397_v40 = vpop.f32.mrb[8].mxu0 }
  0xeb   :  { %v1399_v41 = vpop.f32.mrb[9].mxu0 }
  0xec   :  { %v1401_v42 = vpop.f32.mrb[10].mxu0  ;;  %v184_v24 = vadd.f32 %v1372_v28, %v1399_v41 }
  0xed   :  { %v1403_v43 = vpop.f32.mrb[11].mxu0 }
  0xf2   :  { %v1405_v44 = vpop.f32.mrb[12].mxu0 }
  0xf3   :  { %v1407_v45 = vpop.f32.mrb[13].mxu0 }
  0xf4   :  { %v331_v30 = vpop.f32.mrb[0].mxu1  ;;  %v1409_v46 = vpop.f32.mrb[14].mxu0 }
  0xf5   :  { %v340_v32 = vadd.f32 %v331_v30, %v152_v29  ;;  %v1008_v33 = vpop.f32.mrb[1].mxu1  ;;  %v1411_v47 = vpop.f32.mrb[15].mxu0  ;;  %v187_v29 = vadd.f32 %v1372_v28, %v1403_v43 }
  0xf6   :  { %v334_v34 = vpop.f32.mrb[2].mxu1 }
  0xf7   :  { %v341_v35 = vadd.f32 %v334_v34, %v155_v31  ;;  %v1009_v36 = vpop.f32.mrb[3].mxu1  ;;  %1170 = vtanh.f32 %v340_v32 }
  0xf9   :  { %1172 = vtanh.f32 %v341_v35 }
 0x101   :  { %v1171_v37 = vpop.eup %1170 }
 0x103   :  { %v1173_v38 = vpop.eup %1172 }
 0x104   :  { %v344_v39 = vpack.c.bf16 %v1173_v38, %v1171_v37 }
 0x106   :  { %848 = vst [vmem:[%s1534_s4] sm:$0xff] %v344_v39   ;;  %1027 = vmatmul.mubr.bf16.vlgmr.msra.gmra.mrb[16].mxu0 %v344_v39 }
 0x107   :  { %1051 = vmatpush3.bf16.msra.mxu0 %v1234_v1  ;;  %1066 = vmatprep.mubr.msk.bf16.mxu0 %vm1203_vm0, %v1202_v0 }
 0x108   :  { %1052 = vmatprep.subr.bf16.mxu0 %v1202_v0 }
 0x10b   :  { %1053 = vmatpush3.bf16.msra.mxu0 %v1242_v2 }
 0x10c   :  { %1054 = vmatprep.subr.bf16.mxu0 %v1202_v0 }
 0x10f   :  { %1055 = vmatpush3.bf16.msra.mxu0 %v1248_v3 }
 0x110   :  { %1056 = vmatprep.subr.bf16.mxu0 %v1202_v0 }
 0x113   :  { %1057 = vmatpush3.bf16.msra.mxu0 %v1267_v8 }
 0x114   :  { %1058 = vmatprep.subr.bf16.mxu0 %v1202_v0 }
 0x117   :  { %1059 = vmatpush3.bf16.msra.mxu0 %v1277_v10 }
 0x118   :  { %1060 = vmatprep.subr.bf16.mxu0 %v1202_v0 }
 0x11b   :  { %1061 = vmatpush3.bf16.msra.mxu0 %v1293_v12 }
 0x11c   :  { %1062 = vmatprep.subr.bf16.mxu0 %v1202_v0 }
 0x11f   :  { %1063 = vmatpush3.bf16.msra.mxu0 %v1303_v13 }
 0x120   :  { %1064 = vmatprep.subr.bf16.mxu0 %v1202_v0 }
 0x123   :  { %1065 = vmatpush3.bf16.msra.mxu0 %v1312_v14 }
 0x124   :  { %1090 = vmatprep.subr.bf16.mxu0 %v1202_v0 }
 0x1d9   :  { %v388_v49 = vpop.f32.mrb[16].mxu0 }
 0x1da   :  { %v398_v51 = vadd.f32 %v388_v49, %v160_v48  ;;  %v1028_v52 = vpop.f32.mrb[17].mxu0 }
 0x1db   :  { %v391_v53 = vpop.f32.mrb[18].mxu0 }
 0x1dc   :  { %v399_v54 = vadd.f32 %v391_v53, %v163_v50  ;;  %v1029_v55 = vpop.f32.mrb[19].mxu0  ;;  %1174 = vtanh.f32 %v398_v51 }
 0x1de   :  { %1176 = vtanh.f32 %v399_v54 }
 0x1e6   :  { %v1175_v56 = vpop.eup %1174 }
 0x1e8   :  { %v1177_v57 = vpop.eup %1176 }
 0x1e9   :  { %v402_v58 = vpack.c.bf16 %v1177_v57, %v1175_v56 }
 0x1eb   :  { %884 = vst [vmem:[%s1534_s4 + $0x8] sm:$0xff] %v402_v58   ;;  %1047 = vmatmul.mubr.bf16.vlgmr.msra.gmra.mrb[4].mxu1 %v402_v58 }
 0x1ec   :  { %1071 = vmatpush3.bf16.msra.mxu1 %v1234_v1  ;;  %1086 = vmatprep.mubr.msk.bf16.mxu1 %vm1203_vm0, %v1202_v0 }
 0x1ed   :  { %1072 = vmatprep.subr.bf16.mxu1 %v1202_v0 }
 0x1f0   :  { %1073 = vmatpush3.bf16.msra.mxu1 %v1242_v2 }
 0x1f1   :  { %1074 = vmatprep.subr.bf16.mxu1 %v1202_v0 }
 0x1f4   :  { %1075 = vmatpush3.bf16.msra.mxu1 %v1248_v3 }
 0x1f5   :  { %1076 = vmatprep.subr.bf16.mxu1 %v1202_v0 }
 0x1f8   :  { %1077 = vmatpush3.bf16.msra.mxu1 %v1267_v8 }
 0x1f9   :  { %1078 = vmatprep.subr.bf16.mxu1 %v1202_v0 }
 0x1fc   :  { %1079 = vmatpush3.bf16.msra.mxu1 %v1277_v10 }
 0x1fd   :  { %1080 = vmatprep.subr.bf16.mxu1 %v1202_v0 }
 0x200   :  { %1081 = vmatpush3.bf16.msra.mxu1 %v1293_v12 }
 0x201   :  { %1082 = vmatprep.subr.bf16.mxu1 %v1202_v0 }
 0x204   :  { %1083 = vmatpush3.bf16.msra.mxu1 %v1303_v13 }
 0x205   :  { %1084 = vmatprep.subr.bf16.mxu1 %v1202_v0 }
 0x208   :  { %1085 = vmatpush3.bf16.msra.mxu1 %v1312_v14 }
 0x209   :  { %1110 = vmatprep.subr.bf16.mxu1 %v1202_v0 }
 0x2be   :  { %v447_v60 = vpop.f32.mrb[4].mxu1 }
 0x2bf   :  { %v457_v62 = vadd.f32 %v447_v60, %v168_v59  ;;  %v1048_v63 = vpop.f32.mrb[5].mxu1 }
 0x2c0   :  { %v450_v4 = vpop.f32.mrb[6].mxu1 }
 0x2c1   :  { %v458_v5 = vadd.f32 %v450_v4, %v171_v61  ;;  %v1049_v6 = vpop.f32.mrb[7].mxu1  ;;  %1178 = vtanh.f32 %v457_v62 }
 0x2c3   :  { %1180 = vtanh.f32 %v458_v5 }
 0x2cb   :  { %v1179_v7 = vpop.eup %1178 }
 0x2cd   :  { %v1181_v9 = vpop.eup %1180 }
 0x2ce   :  { %v461_v11 = vpack.c.bf16 %v1181_v9, %v1179_v7 }
 0x2d0   :  { %885 = vst [vmem:[%s1534_s4 + $0x10] sm:$0xff] %v461_v11   ;;  %1067 = vmatmul.mubr.bf16.vlgmr.msra.gmra.mrb[20].mxu0 %v461_v11 }
 0x2d1   :  { %1091 = vmatpush3.bf16.msra.mxu0 %v1234_v1  ;;  %1106 = vmatprep.mubr.msk.bf16.mxu0 %vm1203_vm0, %v1202_v0 }
 0x2d2   :  { %1092 = vmatprep.subr.bf16.mxu0 %v1202_v0 }
 0x2d5   :  { %1093 = vmatpush3.bf16.msra.mxu0 %v1242_v2 }
 0x2d6   :  { %1094 = vmatprep.subr.bf16.mxu0 %v1202_v0 }
 0x2d9   :  { %1095 = vmatpush3.bf16.msra.mxu0 %v1248_v3 }
 0x2da   :  { %1096 = vmatprep.subr.bf16.mxu0 %v1202_v0 }
 0x2dd   :  { %1097 = vmatpush3.bf16.msra.mxu0 %v1267_v8 }
 0x2de   :  { %1098 = vmatprep.subr.bf16.mxu0 %v1202_v0 }
 0x2e1   :  { %1099 = vmatpush3.bf16.msra.mxu0 %v1277_v10 }
 0x2e2   :  { %1100 = vmatprep.subr.bf16.mxu0 %v1202_v0 }
 0x2e5   :  { %1101 = vmatpush3.bf16.msra.mxu0 %v1293_v12 }
 0x2e6   :  { %1102 = vmatprep.subr.bf16.mxu0 %v1202_v0 }
 0x2e9   :  { %1103 = vmatpush3.bf16.msra.mxu0 %v1303_v13 }
 0x2ea   :  { %1104 = vmatprep.subr.bf16.mxu0 %v1202_v0 }
 0x2ed   :  { %1105 = vmatpush3.bf16.msra.mxu0 %v1312_v14 }
 0x2ee   :  { %1130 = vmatprep.subr.bf16.mxu0 %v1202_v0 }
 0x3a3   :  { %v506_v16 = vpop.f32.mrb[20].mxu0 }
 0x3a4   :  { %v516_v18 = vadd.f32 %v506_v16, %v176_v15  ;;  %v1068_v19 = vpop.f32.mrb[21].mxu0 }
 0x3a5   :  { %v509_v20 = vpop.f32.mrb[22].mxu0 }
 0x3a6   :  { %v517_v21 = vadd.f32 %v509_v20, %v179_v17  ;;  %v1069_v22 = vpop.f32.mrb[23].mxu0  ;;  %1182 = vtanh.f32 %v516_v18 }
 0x3a8   :  { %1184 = vtanh.f32 %v517_v21 }
 0x3b0   :  { %v1183_v23 = vpop.eup %1182 }
 0x3b2   :  { %v1185_v25 = vpop.eup %1184 }
 0x3b3   :  { %v520_v27 = vpack.c.bf16 %v1185_v25, %v1183_v23 }
 0x3b5   :  { %886 = vst [vmem:[%s1534_s4 + $0x18] sm:$0xff] %v520_v27   ;;  %1087 = vmatmul.mubr.bf16.vlgmr.msra.gmra.mrb[8].mxu1 %v520_v27 }
 0x3b6   :  { %1111 = vmatpush3.bf16.msra.mxu1 %v1234_v1  ;;  %1126 = vmatprep.mubr.msk.bf16.mxu1 %vm1203_vm0, %v1202_v0 }
 0x3b7   :  { %1112 = vmatprep.subr.bf16.mxu1 %v1202_v0 }
 0x3ba   :  { %1113 = vmatpush3.bf16.msra.mxu1 %v1242_v2 }
 0x3bb   :  { %1114 = vmatprep.subr.bf16.mxu1 %v1202_v0 }
 0x3be   :  { %1115 = vmatpush3.bf16.msra.mxu1 %v1248_v3 }
 0x3bf   :  { %1116 = vmatprep.subr.bf16.mxu1 %v1202_v0 }
 0x3c2   :  { %1117 = vmatpush3.bf16.msra.mxu1 %v1267_v8 }
 0x3c3   :  { %1118 = vmatprep.subr.bf16.mxu1 %v1202_v0 }
 0x3c6   :  { %1119 = vmatpush3.bf16.msra.mxu1 %v1277_v10 }
 0x3c7   :  { %1120 = vmatprep.subr.bf16.mxu1 %v1202_v0 }
 0x3ca   :  { %1121 = vmatpush3.bf16.msra.mxu1 %v1293_v12 }
 0x3cb   :  { %1122 = vmatprep.subr.bf16.mxu1 %v1202_v0 }
 0x3ce   :  { %1123 = vmatpush3.bf16.msra.mxu1 %v1303_v13 }
 0x3cf   :  { %1124 = vmatprep.subr.bf16.mxu1 %v1202_v0 }
 0x3d2   :  { %1125 = vmatpush3.bf16.msra.mxu1 %v1312_v14 }
 0x488   :  { %v565_v26 = vpop.f32.mrb[8].mxu1 }
 0x489   :  { %v575_v30 = vadd.f32 %v565_v26, %v184_v24  ;;  %v1088_v31 = vpop.f32.mrb[9].mxu1 }
 0x48a   :  { %v568_v32 = vpop.f32.mrb[10].mxu1 }
 0x48b   :  { %v576_v33 = vadd.f32 %v568_v32, %v187_v29  ;;  %v1089_v34 = vpop.f32.mrb[11].mxu1  ;;  %1186 = vtanh.f32 %v575_v30 }
 0x48d   :  { %1188 = vtanh.f32 %v576_v33 }
 0x495   :  { %v1187_v35 = vpop.eup %1186 }
 0x497   :  { %v1189_v36 = vpop.eup %1188 }
 0x498   :  { %v579_v37 = vpack.c.bf16 %v1189_v36, %v1187_v35 }
 0x49a   :  { %887 = vst [vmem:[%s1534_s4 + $0x20] sm:$0xff] %v579_v37   ;;  %1107 = vmatmul.mubr.bf16.vlgmr.msra.gmra.mrb[24].mxu0 %v579_v37 }
 0x49b   :  { %1131 = vmatpush3.bf16.msra.mxu0 %v1234_v1  ;;  %1146 = vmatprep.mubr.msk.bf16.mxu0 %vm1203_vm0, %v1202_v0  ;;  %v192_v1 = vadd.f32 %v1397_v40, %v1372_v28  ;;  %v203_v40 = vadd.f32 %v1372_v28, %v1411_v47  ;;  %v211_v47 = vadd.f32 %v1409_v46, %v1372_v28 }
 0x49c   :  { %1132 = vmatprep.subr.bf16.mxu0 %v1202_v0 }
 0x49f   :  { %1133 = vmatpush3.bf16.msra.mxu0 %v1242_v2 }
 0x4a0   :  { %1134 = vmatprep.subr.bf16.mxu0 %v1202_v0 }
 0x4a3   :  { %1135 = vmatpush3.bf16.msra.mxu0 %v1248_v3  ;;  %v195_v3 = vadd.f32 %v1401_v42, %v1372_v28 }
 0x4a4   :  { %1136 = vmatprep.subr.bf16.mxu0 %v1202_v0 }
 0x4a7   :  { %1137 = vmatpush3.bf16.msra.mxu0 %v1267_v8 }
 0x4a8   :  { %1138 = vmatprep.subr.bf16.mxu0 %v1202_v0 }
 0x4ab   :  { %1139 = vmatpush3.bf16.msra.mxu0 %v1277_v10 }
 0x4ac   :  { %1140 = vmatprep.subr.bf16.mxu0 %v1202_v0 }
 0x4af   :  { %1141 = vmatpush3.bf16.msra.mxu0 %v1293_v12 }
 0x4b0   :  { %1142 = vmatprep.subr.bf16.mxu0 %v1202_v0 }
 0x4b3   :  { %1143 = vmatpush3.bf16.msra.mxu0 %v1303_v13 }
 0x4b4   :  { %1144 = vmatprep.subr.bf16.mxu0 %v1202_v0  ;;  %v200_v0 = vadd.f32 %v1372_v28, %v1407_v45  ;;  %v208_v45 = vadd.f32 %v1405_v44, %v1372_v28 }
 0x4b7   :  { %1145 = vmatpush3.bf16.msra.mxu0 %v1312_v14 }
 0x56d   :  { %v624_v2 = vpop.f32.mrb[24].mxu0 }
 0x56e   :  { %v634_v8 = vadd.f32 %v624_v2, %v192_v1  ;;  %v1108_v10 = vpop.f32.mrb[25].mxu0 }
 0x56f   :  { %v627_v38 = vpop.f32.mrb[26].mxu0 }
 0x570   :  { %v635_v39 = vadd.f32 %v627_v38, %v195_v3  ;;  %v1109_v12 = vpop.f32.mrb[27].mxu0  ;;  %1190 = vtanh.f32 %v634_v8 }
 0x572   :  { %1192 = vtanh.f32 %v635_v39 }
 0x57a   :  { %v1191_v41 = vpop.eup %1190 }
 0x57c   :  { %v1193_v13 = vpop.eup %1192 }
 0x57d   :  { %v638_v43 = vpack.c.bf16 %v1193_v13, %v1191_v41 }
 0x57f   :  { %888 = vst [vmem:[%s1534_s4 + $0x28] sm:$0xff] %v638_v43   ;;  %1127 = vmatmul.mubr.bf16.vlgmr.msra.gmra.mrb[12].mxu1 %v638_v43 }
 0x652   :  { %v683_v14 = vpop.f32.mrb[12].mxu1 }
 0x653   :  { %v693_v42 = vadd.f32 %v683_v14, %v200_v0  ;;  %v1128_v48 = vpop.f32.mrb[13].mxu1 }
 0x654   :  { %v686_v49 = vpop.f32.mrb[14].mxu1 }
 0x655   :  { %v694_v50 = vadd.f32 %v686_v49, %v203_v40  ;;  %v1129_v51 = vpop.f32.mrb[15].mxu1  ;;  %1194 = vtanh.f32 %v693_v42 }
 0x657   :  { %1196 = vtanh.f32 %v694_v50 }
 0x65f   :  { %v1195_v52 = vpop.eup %1194 }
 0x661   :  { %v1197_v53 = vpop.eup %1196 }
 0x662   :  { %v697_v54 = vpack.c.bf16 %v1197_v53, %v1195_v52 }
 0x664   :  { %889 = vst [vmem:[%s1534_s4 + $0x30] sm:$0xff] %v697_v54   ;;  %1147 = vmatmul.mubr.bf16.vlgmr.msra.gmra.mrb[28].mxu0 %v697_v54 }
 0x737   :  { %v742_v55 = vpop.f32.mrb[28].mxu0 }
 0x738   :  { %v752_v56 = vadd.f32 %v742_v55, %v208_v45  ;;  %v1148_v57 = vpop.f32.mrb[29].mxu0 }
 0x739   :  { %v745_v58 = vpop.f32.mrb[30].mxu0 }
 0x73a   :  { %v753_v59 = vadd.f32 %v745_v58, %v211_v47  ;;  %v1149_v60 = vpop.f32.mrb[31].mxu0  ;;  %1198 = vtanh.f32 %v752_v56 }
 0x73c   :  { %1200 = vtanh.f32 %v753_v59 }
 0x744   :  { %v1199_v61 = vpop.eup %1198 }
 0x746   :  { %v1201_v62 = vpop.eup %1200 }
 0x747   :  { %v882_v63 = vpack.c.bf16 %v1201_v62, %v1199_v61 }
 0x749   :  { %890 = vst [vmem:[%s1534_s4 + $0x38] sm:$0xff] %v882_v63  }

// kernel: rnn_forward.3
= control target key start
LH: loop header
LB: loop body
LE: loop exit
PB: predicated region body
PF: predicated region fallthrough
CT: control target
= control target key end

     0   :  { %v1271_v1 = vmov 0.0   ;;  %vm1272_vm0 = vmmov 0   ;;  %v1273_v20 = vmov 0.0|0.0   ;;  %s1641_s1 = inlined_call_operand.vmem [shape: bf16[128,128], index: 1, kind: input, shape index: {}]   ;;  %s1642_s2 = inlined_call_operand.vmem [shape: bf16[128,128], index: 2, kind: input, shape index: {}]   ;;  %s1643_s0 = inlined_call_operand.vmem [shape: bf16[8,16,128], index: 0, kind: input, shape index: {}]   ;;  %s1644_s3 = inlined_call_operand.vmem [shape: f32[1,128], index: 3, kind: input, shape index: {}]   ;;  %s1645_s4 = inlined_call_operand.vmem [shape: bf16[128,128], index: 4, kind: input, shape index: {}]   ;;  %s1646_s5 = inlined_call_operand.vmem [shape: f32[1,128], index: 5, kind: input, shape index: {}]   ;;  %s1647_s6 = inlined_call_operand.vmem [shape: f32[16,128], index: 6, kind: output, shape index: {}]  }
   0x1   :  { %v1207_v0 = vld [vmem:[%s1641_s1] sm:$0xff]   ;;  %1024 = vmatprep.subr.bf16.mxu1 %v1271_v1  ;;  %1040 = vmatprep.mubr.msk.bf16.mxu1 %vm1272_vm0, %v1271_v1  ;;  %v1209_v3 = vld [vmem:[%s1641_s1 + $0x8] sm:$0xff]   ;;  %v1211_v5 = vld [vmem:[%s1641_s1 + $0x10] sm:$0xff]  }
   0x2   :  { %v1318_v2 = vld [vmem:[%s1642_s2] sm:$0xff]   ;;  %992 = vmatprep.subr.bf16.mxu0 %v1207_v0  ;;  %v1327_v4 = vld [vmem:[%s1642_s2 + $0x8] sm:$0xff]   ;;  %v1337_v6 = vld [vmem:[%s1642_s2 + $0x10] sm:$0xff]  }
   0x3   :  { %993 = vmatpush3.bf16.msra.mxu0 %v1207_v0  ;;  %1025 = vmatpush3.bf16.msra.mxu1 %v1318_v2  ;;  %v1213_v7 = vld [vmem:[%s1641_s1 + $0x18] sm:$0xff]   ;;  %v1215_v9 = vld [vmem:[%s1641_s1 + $0x20] sm:$0xff]   ;;  %v1217_v11 = vld [vmem:[%s1641_s1 + $0x28] sm:$0xff]  }
   0x4   :  { %994 = vmatprep.subr.bf16.mxu0 %v1209_v3  ;;  %1026 = vmatprep.subr.bf16.mxu1 %v1271_v1  ;;  %v1347_v8 = vld [vmem:[%s1642_s2 + $0x18] sm:$0xff]   ;;  %v1356_v10 = vld [vmem:[%s1642_s2 + $0x20] sm:$0xff]   ;;  %v1369_v13 = vld [vmem:[%s1642_s2 + $0x28] sm:$0xff]  }
   0x5   :  { %v1223_v12 = vld [vmem:[%s1643_s0] sm:$0xff]   ;;  %v1219_v14 = vld [vmem:[%s1641_s1 + $0x30] sm:$0xff]   ;;  %v1221_v16 = vld [vmem:[%s1641_s1 + $0x38] sm:$0xff]  }
   0x6   :  { %1008 = vmatprep.mubr.bf16.mxu0 %v1223_v12  ;;  %v1380_v15 = vld [vmem:[%s1642_s2 + $0x30] sm:$0xff]   ;;  %v1390_v17 = vld [vmem:[%s1642_s2 + $0x38] sm:$0xff]   ;;  %v1224_v18 = vld [vmem:[%s1643_s0 + $0x8] sm:$0xff]  }
   0x7   :  { %995 = vmatpush3.bf16.msra.mxu0 %v1209_v3  ;;  %1027 = vmatpush3.bf16.msra.mxu1 %v1327_v4  ;;  %v1225_v19 = vld [vmem:[%s1643_s0 + $0x10] sm:$0xff]   ;;  %v1226_v21 = vld [vmem:[%s1643_s0 + $0x18] sm:$0xff]   ;;  %v1227_v22 = vld [vmem:[%s1643_s0 + $0x20] sm:$0xff]  }
   0x8   :  { %996 = vmatprep.subr.bf16.mxu0 %v1211_v5  ;;  %1028 = vmatprep.subr.bf16.mxu1 %v1271_v1  ;;  %v1228_v23 = vld [vmem:[%s1643_s0 + $0x28] sm:$0xff]   ;;  %v1229_v24 = vld [vmem:[%s1643_s0 + $0x30] sm:$0xff]   ;;  %v1230_v25 = vld [vmem:[%s1643_s0 + $0x38] sm:$0xff]  }
   0x9   :  { %v1456_v26 = vld [vmem:[%s1644_s3] ss:$0 sm:$0xff] }
   0xb   :  { %997 = vmatpush3.bf16.msra.mxu0 %v1211_v5  ;;  %1029 = vmatpush3.bf16.msra.mxu1 %v1337_v6 }
   0xc   :  { %998 = vmatprep.subr.bf16.mxu0 %v1213_v7  ;;  %1030 = vmatprep.subr.bf16.mxu1 %v1271_v1 }
   0xf   :  { %999 = vmatpush3.bf16.msra.mxu0 %v1213_v7  ;;  %1031 = vmatpush3.bf16.msra.mxu1 %v1347_v8 }
  0x10   :  { %1000 = vmatprep.subr.bf16.mxu0 %v1215_v9  ;;  %1032 = vmatprep.subr.bf16.mxu1 %v1271_v1 }
  0x13   :  { %1001 = vmatpush3.bf16.msra.mxu0 %v1215_v9  ;;  %1033 = vmatpush3.bf16.msra.mxu1 %v1356_v10 }
  0x14   :  { %1002 = vmatprep.subr.bf16.mxu0 %v1217_v11  ;;  %1034 = vmatprep.subr.bf16.mxu1 %v1271_v1 }
  0x17   :  { %1003 = vmatpush3.bf16.msra.mxu0 %v1217_v11  ;;  %1035 = vmatpush3.bf16.msra.mxu1 %v1369_v13 }
  0x18   :  { %1004 = vmatprep.subr.bf16.mxu0 %v1219_v14  ;;  %1036 = vmatprep.subr.bf16.mxu1 %v1271_v1 }
  0x1b   :  { %1005 = vmatpush3.bf16.msra.mxu0 %v1219_v14  ;;  %1037 = vmatpush3.bf16.msra.mxu1 %v1380_v15 }
  0x1c   :  { %1006 = vmatprep.subr.bf16.mxu0 %v1221_v16  ;;  %1038 = vmatprep.subr.bf16.mxu1 %v1271_v1 }
  0x1f   :  { %1007 = vmatpush3.bf16.msra.mxu0 %v1221_v16  ;;  %1039 = vmatpush3.bf16.msra.mxu1 %v1390_v17 }
  0x20   :  { %1044 = vmatprep.subr.bf16.mxu0 %v1271_v1  ;;  %1064 = vmatprep.subr.bf16.mxu1 %v1271_v1 }
  0x22   :  { %1009 = vmatmul.mubr.bf16.vlgmr.msra.gmra.mrb[0].mxu0 %v1224_v18  ;;  %1041 = vmatmul.mubr.bf16.vlgmr.msra.gmra.mrb[0].mxu1 %v1273_v20 }
  0x23   :  { %1045 = vmatpush3.bf16.msra.mxu0 %v1318_v2  ;;  %1012 = vmatprep.mubr.bf16.mxu0 %v1225_v19 }
  0x24   :  { %1046 = vmatprep.subr.bf16.mxu0 %v1271_v1  ;;  %1065 = vmatpush3.bf16.msra.mxu1 %v1318_v2 }
  0x25   :  { %1066 = vmatprep.subr.bf16.mxu1 %v1271_v1  ;;  %1080 = vmatprep.mubr.msk.bf16.mxu1 %vm1272_vm0, %v1271_v1 }
  0x27   :  { %1047 = vmatpush3.bf16.msra.mxu0 %v1327_v4 }
  0x28   :  { %1048 = vmatprep.subr.bf16.mxu0 %v1271_v1  ;;  %1067 = vmatpush3.bf16.msra.mxu1 %v1327_v4 }
  0x29   :  { %1068 = vmatprep.subr.bf16.mxu1 %v1271_v1 }
  0x2a   :  { %1013 = vmatmul.mubr.bf16.gmra.mrb[4].mxu0 %v1226_v21 }
  0x2b   :  { %1049 = vmatpush3.bf16.msra.mxu0 %v1337_v6  ;;  %1016 = vmatprep.mubr.bf16.mxu0 %v1227_v22 }
  0x2c   :  { %1050 = vmatprep.subr.bf16.mxu0 %v1271_v1  ;;  %1069 = vmatpush3.bf16.msra.mxu1 %v1337_v6 }
  0x2d   :  { %1070 = vmatprep.subr.bf16.mxu1 %v1271_v1 }
  0x2f   :  { %1051 = vmatpush3.bf16.msra.mxu0 %v1347_v8 }
  0x30   :  { %1052 = vmatprep.subr.bf16.mxu0 %v1271_v1  ;;  %1071 = vmatpush3.bf16.msra.mxu1 %v1347_v8 }
  0x31   :  { %1072 = vmatprep.subr.bf16.mxu1 %v1271_v1 }
  0x32   :  { %1017 = vmatmul.mubr.bf16.gmra.mrb[8].mxu0 %v1228_v23 }
  0x33   :  { %1053 = vmatpush3.bf16.msra.mxu0 %v1356_v10  ;;  %1020 = vmatprep.mubr.bf16.mxu0 %v1229_v24 }
  0x34   :  { %1054 = vmatprep.subr.bf16.mxu0 %v1271_v1  ;;  %1073 = vmatpush3.bf16.msra.mxu1 %v1356_v10 }
  0x35   :  { %1074 = vmatprep.subr.bf16.mxu1 %v1271_v1 }
  0x37   :  { %1055 = vmatpush3.bf16.msra.mxu0 %v1369_v13 }
  0x38   :  { %1056 = vmatprep.subr.bf16.mxu0 %v1271_v1  ;;  %1075 = vmatpush3.bf16.msra.mxu1 %v1369_v13 }
  0x39   :  { %1076 = vmatprep.subr.bf16.mxu1 %v1271_v1 }
  0x3a   :  { %1021 = vmatmul.mubr.bf16.gmra.mrb[12].mxu0 %v1230_v25 }
  0x3b   :  { %1057 = vmatpush3.bf16.msra.mxu0 %v1380_v15  ;;  %1060 = vmatprep.mubr.msk.bf16.mxu0 %vm1272_vm0, %v1271_v1 }
  0x3c   :  { %1058 = vmatprep.subr.bf16.mxu0 %v1271_v1  ;;  %1077 = vmatpush3.bf16.msra.mxu1 %v1380_v15 }
  0x3d   :  { %1078 = vmatprep.subr.bf16.mxu1 %v1271_v1 }
  0x3f   :  { %1059 = vmatpush3.bf16.msra.mxu0 %v1390_v17 }
  0x40   :  { %1079 = vmatpush3.bf16.msra.mxu1 %v1390_v17  ;;  %1084 = vmatprep.subr.bf16.mxu0 %v1271_v1 }
  0x41   :  { %1104 = vmatprep.subr.bf16.mxu1 %v1271_v1 }
  0xf5   :  { %v1010_v27 = vpop.f32.mrb[0].mxu0  ;;  %v379_v28 = vpop.f32.mrb[0].mxu1 }
  0xf6   :  { %v199_v29 = vpop.f32.mrb[1].mxu0  ;;  %v1042_v30 = vpop.f32.mrb[1].mxu1  ;;  %v208_v54 = vadd.f32 %v1010_v27, %v1456_v26 }
  0xf7   :  { %v200_v31 = vadd.f32 %v1456_v26, %v199_v29  ;;  %v1011_v32 = vpop.f32.mrb[2].mxu0  ;;  %v382_v33 = vpop.f32.mrb[2].mxu1 }
  0xf8   :  { %v202_v34 = vpop.f32.mrb[3].mxu0  ;;  %v1043_v35 = vpop.f32.mrb[3].mxu1  ;;  %v211_v56 = vadd.f32 %v1011_v32, %v1456_v26 }
  0xf9   :  { %v388_v36 = vadd.f32 %v379_v28, %v200_v31  ;;  %v203_v37 = vadd.f32 %v1456_v26, %v202_v34 }
  0xfb   :  { %v389_v38 = vadd.f32 %v382_v33, %v203_v37  ;;  %1239 = vtanh.f32 %v388_v36 }
  0xfd   :  { %1241 = vtanh.f32 %v389_v38  ;;  %v1460_v39 = vpop.f32.mrb[4].mxu0 }
  0xfe   :  { %v1462_v40 = vpop.f32.mrb[5].mxu0  ;;  %v224_v21 = vadd.f32 %v1460_v39, %v1456_v26 }
  0xff   :  { %v1464_v41 = vpop.f32.mrb[6].mxu0  ;;  %v216_v3 = vadd.f32 %v1456_v26, %v1462_v40 }
 0x100   :  { %v1466_v42 = vpop.f32.mrb[7].mxu0  ;;  %v227_v23 = vadd.f32 %v1464_v41, %v1456_v26 }
 0x101   :  { %v219_v7 = vadd.f32 %v1456_v26, %v1466_v42 }
 0x105   :  { %v1240_v43 = vpop.eup %1239  ;;  %v1486_v46 = vpop.f32.mrb[8].mxu0 }
 0x106   :  { %v1488_v47 = vpop.f32.mrb[9].mxu0 }
 0x107   :  { %v1242_v44 = vpop.eup %1241  ;;  %v1490_v48 = vpop.f32.mrb[10].mxu0  ;;  %v232_v33 = vadd.f32 %v1456_v26, %v1488_v47 }
 0x108   :  { %v392_v45 = vpack.c.bf16 %v1242_v44, %v1240_v43  ;;  %v1492_v49 = vpop.f32.mrb[11].mxu0 }
 0x109   :  { %v235_v35 = vadd.f32 %v1456_v26, %v1492_v49 }
 0x10a   :  { %1061 = vmatmul.mubr.bf16.vlgmr.msra.gmra.mrb[16].mxu0 %v392_v45 }
 0x10b   :  { %1085 = vmatpush3.bf16.msra.mxu0 %v1318_v2  ;;  %1100 = vmatprep.mubr.msk.bf16.mxu0 %vm1272_vm0, %v1271_v1 }
 0x10c   :  { %1086 = vmatprep.subr.bf16.mxu0 %v1271_v1 }
 0x10d   :  { %v1494_v50 = vpop.f32.mrb[12].mxu0 }
 0x10e   :  { %v1496_v51 = vpop.f32.mrb[13].mxu0 }
 0x10f   :  { %1087 = vmatpush3.bf16.msra.mxu0 %v1327_v4  ;;  %v1498_v52 = vpop.f32.mrb[14].mxu0 }
 0x110   :  { %1088 = vmatprep.subr.bf16.mxu0 %v1271_v1  ;;  %v1500_v53 = vpop.f32.mrb[15].mxu0 }
 0x113   :  { %1089 = vmatpush3.bf16.msra.mxu0 %v1337_v6 }
 0x114   :  { %1090 = vmatprep.subr.bf16.mxu0 %v1271_v1 }
 0x117   :  { %1091 = vmatpush3.bf16.msra.mxu0 %v1347_v8 }
 0x118   :  { %1092 = vmatprep.subr.bf16.mxu0 %v1271_v1 }
 0x11b   :  { %1093 = vmatpush3.bf16.msra.mxu0 %v1356_v10 }
 0x11c   :  { %1094 = vmatprep.subr.bf16.mxu0 %v1271_v1 }
 0x11f   :  { %1095 = vmatpush3.bf16.msra.mxu0 %v1369_v13 }
 0x120   :  { %1096 = vmatprep.subr.bf16.mxu0 %v1271_v1 }
 0x123   :  { %1097 = vmatpush3.bf16.msra.mxu0 %v1380_v15 }
 0x124   :  { %1098 = vmatprep.subr.bf16.mxu0 %v1271_v1 }
 0x127   :  { %1099 = vmatpush3.bf16.msra.mxu0 %v1390_v17 }
 0x128   :  { %1124 = vmatprep.subr.bf16.mxu0 %v1271_v1 }
 0x1dd   :  { %v427_v55 = vpop.f32.mrb[16].mxu0 }
 0x1de   :  { %v437_v57 = vadd.f32 %v427_v55, %v208_v54  ;;  %v1062_v58 = vpop.f32.mrb[17].mxu0  ;;  %v1234_v54 = vld [vmem:[%s1645_s4 + $0x18] sm:$0xff]   ;;  %v248_v55 = vadd.f32 %v1456_v26, %v1496_v51  ;;  %v1236_v51 = vld [vmem:[%s1645_s4 + $0x28] sm:$0xff]  }
 0x1df   :  { %v430_v59 = vpop.f32.mrb[18].mxu0 }
 0x1e0   :  { %v438_v60 = vadd.f32 %v430_v59, %v211_v56  ;;  %v1063_v61 = vpop.f32.mrb[19].mxu0  ;;  %1243 = vtanh.f32 %v437_v57  ;;  %v251_v57 = vadd.f32 %v1456_v26, %v1500_v53  ;;  %v1237_v53 = vld [vmem:[%s1645_s4 + $0x30] sm:$0xff]  }
 0x1e2   :  { %1245 = vtanh.f32 %v438_v60 }
 0x1ea   :  { %v1244_v62 = vpop.eup %1243 }
 0x1ec   :  { %v1246_v63 = vpop.eup %1245 }
 0x1ed   :  { %v441_v0 = vpack.c.bf16 %v1246_v63, %v1244_v62 }
 0x1ef   :  { %1081 = vmatmul.mubr.bf16.vlgmr.msra.gmra.mrb[4].mxu1 %v441_v0 }
 0x1f0   :  { %1105 = vmatpush3.bf16.msra.mxu1 %v1318_v2  ;;  %1120 = vmatprep.mubr.msk.bf16.mxu1 %vm1272_vm0, %v1271_v1 }
 0x1f1   :  { %1106 = vmatprep.subr.bf16.mxu1 %v1271_v1 }
 0x1f4   :  { %1107 = vmatpush3.bf16.msra.mxu1 %v1327_v4 }
 0x1f5   :  { %1108 = vmatprep.subr.bf16.mxu1 %v1271_v1 }
 0x1f8   :  { %1109 = vmatpush3.bf16.msra.mxu1 %v1337_v6 }
 0x1f9   :  { %1110 = vmatprep.subr.bf16.mxu1 %v1271_v1 }
 0x1fc   :  { %1111 = vmatpush3.bf16.msra.mxu1 %v1347_v8 }
 0x1fd   :  { %1112 = vmatprep.subr.bf16.mxu1 %v1271_v1 }
 0x200   :  { %1113 = vmatpush3.bf16.msra.mxu1 %v1356_v10 }
 0x201   :  { %1114 = vmatprep.subr.bf16.mxu1 %v1271_v1 }
 0x204   :  { %1115 = vmatpush3.bf16.msra.mxu1 %v1369_v13 }
 0x205   :  { %1116 = vmatprep.subr.bf16.mxu1 %v1271_v1 }
 0x208   :  { %1117 = vmatpush3.bf16.msra.mxu1 %v1380_v15 }
 0x209   :  { %1118 = vmatprep.subr.bf16.mxu1 %v1271_v1 }
 0x20c   :  { %1119 = vmatpush3.bf16.msra.mxu1 %v1390_v17 }
 0x20d   :  { %1144 = vmatprep.subr.bf16.mxu1 %v1271_v1 }
 0x2c2   :  { %v476_v5 = vpop.f32.mrb[4].mxu1 }
 0x2c3   :  { %v486_v9 = vadd.f32 %v476_v5, %v216_v3  ;;  %v1082_v11 = vpop.f32.mrb[5].mxu1  ;;  %v1235_v5 = vld [vmem:[%s1645_s4 + $0x20] sm:$0xff]  }
 0x2c4   :  { %v479_v12 = vpop.f32.mrb[6].mxu1 }
 0x2c5   :  { %v487_v14 = vadd.f32 %v479_v12, %v219_v7  ;;  %v1083_v16 = vpop.f32.mrb[7].mxu1  ;;  %1247 = vtanh.f32 %v486_v9  ;;  %v1238_v7 = vld [vmem:[%s1645_s4 + $0x38] sm:$0xff]   ;;  %v256_v9 = vadd.f32 %v1494_v50, %v1456_v26  ;;  %v259_v12 = vadd.f32 %v1498_v52, %v1456_v26 }
 0x2c7   :  { %1249 = vtanh.f32 %v487_v14 }
 0x2cf   :  { %v1248_v18 = vpop.eup %1247 }
 0x2d1   :  { %v1250_v19 = vpop.eup %1249 }
 0x2d2   :  { %v490_v20 = vpack.c.bf16 %v1250_v19, %v1248_v18 }
 0x2d4   :  { %1101 = vmatmul.mubr.bf16.vlgmr.msra.gmra.mrb[20].mxu0 %v490_v20 }
 0x2d5   :  { %1125 = vmatpush3.bf16.msra.mxu0 %v1318_v2  ;;  %1140 = vmatprep.mubr.msk.bf16.mxu0 %vm1272_vm0, %v1271_v1 }
 0x2d6   :  { %1126 = vmatprep.subr.bf16.mxu0 %v1271_v1 }
 0x2d9   :  { %1127 = vmatpush3.bf16.msra.mxu0 %v1327_v4 }
 0x2da   :  { %1128 = vmatprep.subr.bf16.mxu0 %v1271_v1 }
 0x2dd   :  { %1129 = vmatpush3.bf16.msra.mxu0 %v1337_v6 }
 0x2de   :  { %1130 = vmatprep.subr.bf16.mxu0 %v1271_v1 }
 0x2e1   :  { %1131 = vmatpush3.bf16.msra.mxu0 %v1347_v8 }
 0x2e2   :  { %1132 = vmatprep.subr.bf16.mxu0 %v1271_v1 }
 0x2e5   :  { %1133 = vmatpush3.bf16.msra.mxu0 %v1356_v10 }
 0x2e6   :  { %1134 = vmatprep.subr.bf16.mxu0 %v1271_v1 }
 0x2e9   :  { %1135 = vmatpush3.bf16.msra.mxu0 %v1369_v13 }
 0x2ea   :  { %1136 = vmatprep.subr.bf16.mxu0 %v1271_v1 }
 0x2ed   :  { %1137 = vmatpush3.bf16.msra.mxu0 %v1380_v15 }
 0x2ee   :  { %1138 = vmatprep.subr.bf16.mxu0 %v1271_v1 }
 0x2f1   :  { %1139 = vmatpush3.bf16.msra.mxu0 %v1390_v17 }
 0x2f2   :  { %1164 = vmatprep.subr.bf16.mxu0 %v1271_v1 }
 0x3a7   :  { %v525_v22 = vpop.f32.mrb[20].mxu0 }
 0x3a8   :  { %v535_v24 = vadd.f32 %v525_v22, %v224_v21  ;;  %v1102_v25 = vpop.f32.mrb[21].mxu0 }
 0x3a9   :  { %v528_v27 = vpop.f32.mrb[22].mxu0 }
 0x3aa   :  { %v536_v28 = vadd.f32 %v528_v27, %v227_v23  ;;  %v1103_v29 = vpop.f32.mrb[23].mxu0  ;;  %1251 = vtanh.f32 %v535_v24 }
 0x3ac   :  { %1253 = vtanh.f32 %v536_v28 }
 0x3b4   :  { %v1252_v30 = vpop.eup %1251 }
 0x3b6   :  { %v1254_v31 = vpop.eup %1253 }
 0x3b7   :  { %v539_v32 = vpack.c.bf16 %v1254_v31, %v1252_v30 }
 0x3b9   :  { %1121 = vmatmul.mubr.bf16.vlgmr.msra.gmra.mrb[8].mxu1 %v539_v32 }
 0x3ba   :  { %1145 = vmatpush3.bf16.msra.mxu1 %v1318_v2  ;;  %1160 = vmatprep.mubr.msk.bf16.mxu1 %vm1272_vm0, %v1271_v1 }
 0x3bb   :  { %1146 = vmatprep.subr.bf16.mxu1 %v1271_v1 }
 0x3be   :  { %1147 = vmatpush3.bf16.msra.mxu1 %v1327_v4 }
 0x3bf   :  { %1148 = vmatprep.subr.bf16.mxu1 %v1271_v1 }
 0x3c2   :  { %1149 = vmatpush3.bf16.msra.mxu1 %v1337_v6 }
 0x3c3   :  { %1150 = vmatprep.subr.bf16.mxu1 %v1271_v1 }
 0x3c6   :  { %1151 = vmatpush3.bf16.msra.mxu1 %v1347_v8 }
 0x3c7   :  { %1152 = vmatprep.subr.bf16.mxu1 %v1271_v1 }
 0x3ca   :  { %1153 = vmatpush3.bf16.msra.mxu1 %v1356_v10 }
 0x3cb   :  { %1154 = vmatprep.subr.bf16.mxu1 %v1271_v1 }
 0x3ce   :  { %1155 = vmatpush3.bf16.msra.mxu1 %v1369_v13 }
 0x3cf   :  { %1156 = vmatprep.subr.bf16.mxu1 %v1271_v1 }
 0x3d2   :  { %1157 = vmatpush3.bf16.msra.mxu1 %v1380_v15 }
 0x3d3   :  { %1158 = vmatprep.subr.bf16.mxu1 %v1271_v1 }
 0x3d6   :  { %1159 = vmatpush3.bf16.msra.mxu1 %v1390_v17 }
 0x3d7   :  { %1184 = vmatprep.subr.bf16.mxu1 %v1271_v1 }
 0x48c   :  { %v574_v34 = vpop.f32.mrb[8].mxu1 }
 0x48d   :  { %v584_v36 = vadd.f32 %v574_v34, %v232_v33  ;;  %v1122_v37 = vpop.f32.mrb[9].mxu1 }
 0x48e   :  { %v577_v38 = vpop.f32.mrb[10].mxu1 }
 0x48f   :  { %v585_v39 = vadd.f32 %v577_v38, %v235_v35  ;;  %v1123_v40 = vpop.f32.mrb[11].mxu1  ;;  %1255 = vtanh.f32 %v584_v36 }
 0x491   :  { %1257 = vtanh.f32 %v585_v39 }
 0x499   :  { %v1256_v41 = vpop.eup %1255 }
 0x49b   :  { %v1258_v42 = vpop.eup %1257 }
 0x49c   :  { %v588_v43 = vpack.c.bf16 %v1258_v42, %v1256_v41 }
 0x49e   :  { %1141 = vmatmul.mubr.bf16.vlgmr.msra.gmra.mrb[24].mxu0 %v588_v43 }
 0x49f   :  { %1165 = vmatpush3.bf16.msra.mxu0 %v1318_v2  ;;  %1180 = vmatprep.mubr.msk.bf16.mxu0 %vm1272_vm0, %v1271_v1  ;;  %v240_v2 = vadd.f32 %v1486_v46, %v1456_v26  ;;  %v1232_v46 = vld [vmem:[%s1645_s4 + $0x8] sm:$0xff]  }
 0x4a0   :  { %1166 = vmatprep.subr.bf16.mxu0 %v1271_v1 }
 0x4a3   :  { %1167 = vmatpush3.bf16.msra.mxu0 %v1327_v4 }
 0x4a4   :  { %1168 = vmatprep.subr.bf16.mxu0 %v1271_v1 }
 0x4a7   :  { %1169 = vmatpush3.bf16.msra.mxu0 %v1337_v6  ;;  %v243_v6 = vadd.f32 %v1490_v48, %v1456_v26  ;;  %v1233_v48 = vld [vmem:[%s1645_s4 + $0x10] sm:$0xff]  }
 0x4a8   :  { %1170 = vmatprep.subr.bf16.mxu0 %v1271_v1 }
 0x4ab   :  { %1171 = vmatpush3.bf16.msra.mxu0 %v1347_v8 }
 0x4ac   :  { %1172 = vmatprep.subr.bf16.mxu0 %v1271_v1 }
 0x4af   :  { %1173 = vmatpush3.bf16.msra.mxu0 %v1356_v10 }
 0x4b0   :  { %1174 = vmatprep.subr.bf16.mxu0 %v1271_v1 }
 0x4b3   :  { %1175 = vmatpush3.bf16.msra.mxu0 %v1369_v13 }
 0x4b4   :  { %1176 = vmatprep.subr.bf16.mxu0 %v1271_v1 }
 0x4b7   :  { %1177 = vmatpush3.bf16.msra.mxu0 %v1380_v15 }
 0x4b8   :  { %1178 = vmatprep.subr.bf16.mxu0 %v1271_v1 }
 0x4bb   :  { %1179 = vmatpush3.bf16.msra.mxu0 %v1390_v17  ;;  %v1231_v17 = vld [vmem:[%s1645_s4] sm:$0xff]  }
 0x571   :  { %v623_v4 = vpop.f32.mrb[24].mxu0 }
 0x572   :  { %v633_v8 = vadd.f32 %v623_v4, %v240_v2  ;;  %v1142_v10 = vpop.f32.mrb[25].mxu0 }
 0x573   :  { %v626_v44 = vpop.f32.mrb[26].mxu0 }
 0x574   :  { %v634_v45 = vadd.f32 %v626_v44, %v243_v6  ;;  %v1143_v13 = vpop.f32.mrb[27].mxu0  ;;  %1259 = vtanh.f32 %v633_v8 }
 0x576   :  { %1261 = vtanh.f32 %v634_v45 }
 0x57e   :  { %v1260_v47 = vpop.eup %1259 }
 0x580   :  { %v1262_v15 = vpop.eup %1261 }
 0x581   :  { %v637_v49 = vpack.c.bf16 %v1262_v15, %v1260_v47 }
 0x583   :  { %1161 = vmatmul.mubr.bf16.vlgmr.msra.gmra.mrb[12].mxu1 %v637_v49 }
 0x584   :  { %1200 = vmatprep.mubr.msk.bf16.mxu1 %vm1272_vm0, %v1271_v1  ;;  %1185 = vmatpush3.bf16.msra.mxu1 %v1231_v17 }
 0x585   :  { %1186 = vmatprep.subr.bf16.mxu1 %v1271_v1 }
 0x588   :  { %1187 = vmatpush3.bf16.msra.mxu1 %v1232_v46 }
 0x589   :  { %1188 = vmatprep.subr.bf16.mxu1 %v1271_v1 }
 0x58c   :  { %1189 = vmatpush3.bf16.msra.mxu1 %v1233_v48 }
 0x58d   :  { %1190 = vmatprep.subr.bf16.mxu1 %v1271_v1 }
 0x590   :  { %1191 = vmatpush3.bf16.msra.mxu1 %v1234_v54 }
 0x591   :  { %1192 = vmatprep.subr.bf16.mxu1 %v1271_v1 }
 0x594   :  { %1193 = vmatpush3.bf16.msra.mxu1 %v1235_v5 }
 0x595   :  { %1194 = vmatprep.subr.bf16.mxu1 %v1271_v1 }
 0x598   :  { %1195 = vmatpush3.bf16.msra.mxu1 %v1236_v51 }
 0x599   :  { %1196 = vmatprep.subr.bf16.mxu1 %v1271_v1 }
 0x59c   :  { %1197 = vmatpush3.bf16.msra.mxu1 %v1237_v53 }
 0x59d   :  { %1198 = vmatprep.subr.bf16.mxu1 %v1271_v1  ;;  %v886_v1 = vld [vmem:[%s1646_s5] ss:$0 sm:$0xff] }
 0x5a0   :  { %1199 = vmatpush3.bf16.msra.mxu1 %v1238_v7 }
 0x656   :  { %v672_v56 = vpop.f32.mrb[12].mxu1 }
 0x657   :  { %v682_v58 = vadd.f32 %v672_v56, %v248_v55  ;;  %v1162_v59 = vpop.f32.mrb[13].mxu1 }
 0x658   :  { %v675_v60 = vpop.f32.mrb[14].mxu1 }
 0x659   :  { %v683_v61 = vadd.f32 %v675_v60, %v251_v57  ;;  %v1163_v62 = vpop.f32.mrb[15].mxu1  ;;  %1263 = vtanh.f32 %v682_v58 }
 0x65b   :  { %1265 = vtanh.f32 %v683_v61 }
 0x663   :  { %v1264_v63 = vpop.eup %1263 }
 0x665   :  { %v1266_v0 = vpop.eup %1265 }
 0x666   :  { %v686_v3 = vpack.c.bf16 %v1266_v0, %v1264_v63 }
 0x668   :  { %1181 = vmatmul.mubr.bf16.vlgmr.msra.gmra.mrb[28].mxu0 %v686_v3 }
 0x73b   :  { %v721_v11 = vpop.f32.mrb[28].mxu0 }
 0x73c   :  { %v731_v14 = vadd.f32 %v721_v11, %v256_v9  ;;  %v1182_v16 = vpop.f32.mrb[29].mxu0 }
 0x73d   :  { %v724_v18 = vpop.f32.mrb[30].mxu0 }
 0x73e   :  { %v732_v19 = vadd.f32 %v724_v18, %v259_v12  ;;  %v1183_v20 = vpop.f32.mrb[31].mxu0  ;;  %1267 = vtanh.f32 %v731_v14 }
 0x740   :  { %1269 = vtanh.f32 %v732_v19 }
 0x748   :  { %v1268_v21 = vpop.eup %1267 }
 0x74a   :  { %v1270_v22 = vpop.eup %1269 }
 0x74b   :  { %v742_v23 = vpack.c.bf16 %v1270_v22, %v1268_v21 }
 0x74d   :  { %1201 = vmatmul.mubr.bf16.vlgmr.msra.gmra.mrb[16].mxu1 %v742_v23 }
 0x820   :  { %v848_v50 = vpop.f32.mrb[16].mxu1 }
 0x821   :  { %v849_v24 = vadd.f32 %v886_v1, %v848_v50  ;;  %v1202_v25 = vpop.f32.mrb[17].mxu1 }
 0x822   :  { %v851_v27 = vpop.f32.mrb[18].mxu1 }
 0x823   :  { %855 = vst [vmem:[%s1647_s6] sm:$0xff] %v849_v24  ;;  %v852_v26 = vadd.f32 %v886_v1, %v851_v27  ;;  %v1203_v52 = vpop.f32.mrb[19].mxu1 }
 0x825   :  { %856 = vst [vmem:[%s1647_s6 + $0x8] sm:$0xff] %v852_v26 }

</bundles_post_ra>
